<compile_context>
chip_gen: v7x
topology: tpu7x:2x2x1
jax: 0.10.0
libtpu: 0.0.40
codegen_flags: <defaults>
</compile_context>

<pallas_src>
import functools

import jax
import jax.numpy as jnp
import numpy as np
from jax.experimental import pallas as pl
from jax.experimental.pallas import tpu as pltpu


def _round_up(n, m):
    return ((n + m - 1) // m) * m


def _rnn_kernel(x_ref, wx_ref, wh_ref, b_ref, hall_ref, hfin_ref):
    # Padded shapes: x (T, Bp, Ip), Wx^T (Ip, Hp), Wh^T (Hp, Hp), b (1, Hp).
    T, B, I = x_ref.shape
    H = wh_ref.shape[1]

    # Load loop-invariant operands from VMEM exactly once (16 vregs for Wh at
    # Hp=128; ref reads inside the unrolled loop would re-issue the loads on
    # the serial critical path).
    wh = wh_ref[...]
    b = b_ref[...]

    # ---- Phase 1: batched input projection (no serial dependence). ----
    # One GEMM over all timesteps; fused bias folded in; result stays in
    # registers (T*Bp*Hp = 8 vregs at the shapes here).
    x_flat = x_ref[...].reshape(T * B, I)          # layout-free: Bp % 8 == 0
    xw = jnp.dot(
        x_flat,
        wx_ref[...],
        preferred_element_type=jnp.float32,
        precision=jax.lax.Precision.HIGHEST,
    )
    xw = (xw + b).reshape(T, B, H)

    # ---- Phase 2: serial recurrence, one MXU push + tanh per step. ----
    # Fully unrolled with static indices (T is small); each hall_ref[t] is
    # written exactly once. h_{-1} = 0, so step 0 needs no recurrent matmul.
    h = jnp.tanh(xw[0])
    hall_ref[0] = h
    for t in range(1, T):
        h = jnp.tanh(
            xw[t]
            + jnp.dot(
                h,
                wh,
                preferred_element_type=jnp.float32,
                precision=jax.lax.Precision.HIGHEST,
            )
        )
        hall_ref[t] = h
    hfin_ref[...] = h


def prepare_rnn_params(wx, bx, wh, bh):
    """One-time weight glue: transpose, fuse biases, zero-pad to (8,128) tiles.

    Returns (wx_t [Ip,Hp], wh_t [Hp,Hp], b [1,Hp], H). Cache the result and
    reuse it across forward calls so the per-call hot path only pads x.
    """
    H, I = wx.shape
    I_pad = _round_up(max(I, 128), 128)
    H_pad = _round_up(max(H, 128), 128)
    wx_t = jnp.zeros((I_pad, H_pad), jnp.float32).at[:I, :H].set(wx.T)
    wh_t = jnp.zeros((H_pad, H_pad), jnp.float32).at[:H, :H].set(wh.T)
    b = jnp.zeros((1, H_pad), jnp.float32).at[0, :H].set(bx + bh)
    return wx_t, wh_t, b, H


@functools.partial(jax.jit, static_argnums=(4,))
def rnn_forward_prepared(x, wx_t, wh_t, b, H):
    """x: [T, B, I]; prepared padded weights. Returns (h_final, h_all)."""
    T, B, I = x.shape
    I_pad, H_pad = wx_t.shape

    B_pad = _round_up(max(B, 8), 8)
    assert B_pad % 8 == 0  # hard invariant: keeps the (T,B,.) reshapes free
    assert I_pad % 128 == 0 and H_pad % 128 == 0

    # VMEM footprint guard (f32): x + xw/h_all + weights + small extras.
    vmem_bytes = 4 * (
        T * B_pad * (I_pad + H_pad)          # x + h_all (double-buffer-free)
        + I_pad * H_pad + H_pad * H_pad      # Wx^T + Wh^T
        + 2 * B_pad * H_pad + H_pad          # h_final, h regs, bias
    )
    # TODO(synk): switch to a T-chunked grid when vmem_bytes nears the scoped
    #             VMEM limit (esp. v7x, 32 MiB default scoped / 64 MiB phys).
    assert vmem_bytes < 24 * 1024 * 1024, "use the T-chunked fallback"

    x_p = jnp.zeros((T, B_pad, I_pad), jnp.float32).at[:, :B, :I].set(x)

    h_all_p, h_fin_p = pl.pallas_call(
        _rnn_kernel,
        out_shape=(
            jax.ShapeDtypeStruct((T, B_pad, H_pad), jnp.float32),
            jax.ShapeDtypeStruct((B_pad, H_pad), jnp.float32),
        ),
        in_specs=[
            pl.BlockSpec(memory_space=pltpu.MemorySpace.VMEM),  # x (padded)
            pl.BlockSpec(memory_space=pltpu.MemorySpace.VMEM),  # Wx^T
            pl.BlockSpec(memory_space=pltpu.MemorySpace.VMEM),  # Wh^T
            pl.BlockSpec(memory_space=pltpu.MemorySpace.VMEM),  # fused bias
        ],
        out_specs=(
            pl.BlockSpec(memory_space=pltpu.MemorySpace.VMEM),  # h_all
            pl.BlockSpec(memory_space=pltpu.MemorySpace.VMEM),  # h_final
        ),
    )(x_p, wx_t, wh_t, b)

    # Strip padding.
    h_all = h_all_p[:, :B, :H]
    h_final = h_fin_p[:B, :H]
    return h_final, h_all


def rnn_forward(x, wx, bx, wh, bh):
    """Convenience wrapper (prep + forward). Prefer caching prepare_rnn_params
    outside the hot loop when calling repeatedly."""
    wx_t, wh_t, b, H = prepare_rnn_params(wx, bx, wh, bh)
    return rnn_forward_prepared(x, wx_t, wh_t, b, H)


def _reference(x, wx, bx, wh, bh):
    T, B, I = x.shape
    H = wx.shape[0]
    hi = jax.lax.Precision.HIGHEST
    h = jnp.zeros((B, H), jnp.float32)
    hs = []
    for t in range(T):
        h = jnp.tanh(
            jnp.dot(x[t], wx.T, precision=hi)
            + bx
            + jnp.dot(h, wh.T, precision=hi)
            + bh
        )
        hs.append(h)
    return h, jnp.stack(hs)


if __name__ == "__main__":
    # Small shapes implied by the module: seq=8, batch=2, input_size=16, hidden=32
    T, B, I, H = 8, 2, 16, 32

    key = jax.random.PRNGKey(0)
    kx, kwx, kbx, kwh, kbh = jax.random.split(key, 5)

    x = jax.random.normal(kx, (T, B, I), jnp.float32)

    # Deterministic init mimicking nn.Linear's U(-1/sqrt(fan_in), 1/sqrt(fan_in))
    bound_x = 1.0 / np.sqrt(I)
    bound_h = 1.0 / np.sqrt(H)
    wx = jax.random.uniform(kwx, (H, I), jnp.float32, -bound_x, bound_x)
    bx = jax.random.uniform(kbx, (H,), jnp.float32, -bound_x, bound_x)
    wh = jax.random.uniform(kwh, (H, H), jnp.float32, -bound_h, bound_h)
    bh = jax.random.uniform(kbh, (H,), jnp.float32, -bound_h, bound_h)

    # One-time weight glue, then the per-call forward only pads x.
    params = prepare_rnn_params(wx, bx, wh, bh)
    h_final, h_all = rnn_forward_prepared(x, *params)
    jax.block_until_ready((h_final, h_all))

    h_final_ref, h_all_ref = _reference(x, wx, bx, wh, bh)
    np.testing.assert_allclose(np.asarray(h_all), np.asarray(h_all_ref),
                               rtol=1e-5, atol=1e-5)
    np.testing.assert_allclose(np.asarray(h_final), np.asarray(h_final_ref),
                               rtol=1e-5, atol=1e-5)

    print("KERNEL_OK")
</pallas_src>

<mosaic_0001>
module attributes {stable_mosaic.version = 11 : i64} {
  func.func @_rnn_kernel(%arg0: memref<8x8x128xf32, #tpu.memory_space<vmem>>, %arg1: memref<128x128xf32, #tpu.memory_space<vmem>>, %arg2: memref<128x128xf32, #tpu.memory_space<vmem>>, %arg3: memref<1x128xf32, #tpu.memory_space<vmem>>, %arg4: memref<8x8x128xf32, #tpu.memory_space<vmem>>, %arg5: memref<8x128xf32, #tpu.memory_space<vmem>>) attributes {dimension_semantics = [], scalar_prefetch = 0 : i64, scratch_operands = 0 : i64, tpu.core_type = #tpu.core_type<tc>} {
    %c0 = arith.constant 0 : index
    %c0_0 = arith.constant 0 : index
    %0 = vector.load %arg2[%c0, %c0_0] : memref<128x128xf32, #tpu.memory_space<vmem>>, vector<128x128xf32>
    %c0_1 = arith.constant 0 : index
    %c0_2 = arith.constant 0 : index
    %1 = vector.load %arg3[%c0_1, %c0_2] : memref<1x128xf32, #tpu.memory_space<vmem>>, vector<1x128xf32>
    %c0_3 = arith.constant 0 : index
    %c0_4 = arith.constant 0 : index
    %c0_5 = arith.constant 0 : index
    %2 = vector.load %arg0[%c0_3, %c0_4, %c0_5] : memref<8x8x128xf32, #tpu.memory_space<vmem>>, vector<8x8x128xf32>
    %3 = vector.shape_cast %2 : vector<8x8x128xf32> to vector<64x128xf32>
    %c0_6 = arith.constant 0 : index
    %c0_7 = arith.constant 0 : index
    %4 = vector.load %arg1[%c0_6, %c0_7] : memref<128x128xf32, #tpu.memory_space<vmem>>, vector<128x128xf32>
    %cst = arith.constant dense<0.000000e+00> : vector<64x128xf32>
    %5 = tpu.matmul %3, %4, %cst {dimension_numbers = #tpu.dot_dimension_numbers<[1], [0], [0], [1], [0, 0, 1, 1], [], []>, precision = #tpu.contract_precision<fp32>} : vector<64x128xf32>, vector<128x128xf32>, vector<64x128xf32> -> vector<64x128xf32>
    %6 = vector.broadcast %1 : vector<1x128xf32> to vector<64x128xf32>
    %7 = arith.addf %5, %6 : vector<64x128xf32>
    %8 = vector.shape_cast %7 : vector<64x128xf32> to vector<8x8x128xf32>
    %9 = vector.extract_strided_slice %8 {offsets = [0, 0, 0], sizes = [1, 8, 128], strides = [1, 1, 1]} : vector<8x8x128xf32> to vector<1x8x128xf32>
    %10 = vector.shape_cast %9 : vector<1x8x128xf32> to vector<8x128xf32>
    %11 = math.tanh %10 : vector<8x128xf32>
    %c0_8 = arith.constant 0 : index
    %c0_9 = arith.constant 0 : index
    %c0_10 = arith.constant 0 : index
    %12 = vector.load %arg4[%c0_8, %c0_9, %c0_10] : memref<8x8x128xf32, #tpu.memory_space<vmem>>, vector<1x8x128xf32>
    %13 = vector.shape_cast %12 : vector<1x8x128xf32> to vector<8x128xf32>
    %14 = vector.shape_cast %11 : vector<8x128xf32> to vector<1x8x128xf32>
    tpu.vector_store %arg4[%c0_8, %c0_9, %c0_10], %14 {strides = array<i32>} : memref<8x8x128xf32, #tpu.memory_space<vmem>>, vector<1x8x128xf32>,
    %15 = vector.extract_strided_slice %8 {offsets = [1, 0, 0], sizes = [1, 8, 128], strides = [1, 1, 1]} : vector<8x8x128xf32> to vector<1x8x128xf32>
    %16 = vector.shape_cast %15 : vector<1x8x128xf32> to vector<8x128xf32>
    %cst_11 = arith.constant dense<0.000000e+00> : vector<8x128xf32>
    %17 = tpu.matmul %11, %0, %cst_11 {dimension_numbers = #tpu.dot_dimension_numbers<[1], [0], [0], [1], [0, 0, 1, 1], [], []>, precision = #tpu.contract_precision<fp32>} : vector<8x128xf32>, vector<128x128xf32>, vector<8x128xf32> -> vector<8x128xf32>
    %18 = arith.addf %16, %17 : vector<8x128xf32>
    %19 = math.tanh %18 : vector<8x128xf32>
    %c1 = arith.constant 1 : index
    %c0_12 = arith.constant 0 : index
    %c0_13 = arith.constant 0 : index
    %20 = vector.load %arg4[%c1, %c0_12, %c0_13] : memref<8x8x128xf32, #tpu.memory_space<vmem>>, vector<1x8x128xf32>
    %21 = vector.shape_cast %20 : vector<1x8x128xf32> to vector<8x128xf32>
    %22 = vector.shape_cast %19 : vector<8x128xf32> to vector<1x8x128xf32>
    tpu.vector_store %arg4[%c1, %c0_12, %c0_13], %22 {strides = array<i32>} : memref<8x8x128xf32, #tpu.memory_space<vmem>>, vector<1x8x128xf32>,
    %23 = vector.extract_strided_slice %8 {offsets = [2, 0, 0], sizes = [1, 8, 128], strides = [1, 1, 1]} : vector<8x8x128xf32> to vector<1x8x128xf32>
    %24 = vector.shape_cast %23 : vector<1x8x128xf32> to vector<8x128xf32>
    %cst_14 = arith.constant dense<0.000000e+00> : vector<8x128xf32>
    %25 = tpu.matmul %19, %0, %cst_14 {dimension_numbers = #tpu.dot_dimension_numbers<[1], [0], [0], [1], [0, 0, 1, 1], [], []>, precision = #tpu.contract_precision<fp32>} : vector<8x128xf32>, vector<128x128xf32>, vector<8x128xf32> -> vector<8x128xf32>
    %26 = arith.addf %24, %25 : vector<8x128xf32>
    %27 = math.tanh %26 : vector<8x128xf32>
    %c2 = arith.constant 2 : index
    %c0_15 = arith.constant 0 : index
    %c0_16 = arith.constant 0 : index
    %28 = vector.load %arg4[%c2, %c0_15, %c0_16] : memref<8x8x128xf32, #tpu.memory_space<vmem>>, vector<1x8x128xf32>
    %29 = vector.shape_cast %28 : vector<1x8x128xf32> to vector<8x128xf32>
    %30 = vector.shape_cast %27 : vector<8x128xf32> to vector<1x8x128xf32>
    tpu.vector_store %arg4[%c2, %c0_15, %c0_16], %30 {strides = array<i32>} : memref<8x8x128xf32, #tpu.memory_space<vmem>>, vector<1x8x128xf32>,
    %31 = vector.extract_strided_slice %8 {offsets = [3, 0, 0], sizes = [1, 8, 128], strides = [1, 1, 1]} : vector<8x8x128xf32> to vector<1x8x128xf32>
    %32 = vector.shape_cast %31 : vector<1x8x128xf32> to vector<8x128xf32>
    %cst_17 = arith.constant dense<0.000000e+00> : vector<8x128xf32>
    %33 = tpu.matmul %27, %0, %cst_17 {dimension_numbers = #tpu.dot_dimension_numbers<[1], [0], [0], [1], [0, 0, 1, 1], [], []>, precision = #tpu.contract_precision<fp32>} : vector<8x128xf32>, vector<128x128xf32>, vector<8x128xf32> -> vector<8x128xf32>
    %34 = arith.addf %32, %33 : vector<8x128xf32>
    %35 = math.tanh %34 : vector<8x128xf32>
    %c3 = arith.constant 3 : index
    %c0_18 = arith.constant 0 : index
    %c0_19 = arith.constant 0 : index
    %36 = vector.load %arg4[%c3, %c0_18, %c0_19] : memref<8x8x128xf32, #tpu.memory_space<vmem>>, vector<1x8x128xf32>
    %37 = vector.shape_cast %36 : vector<1x8x128xf32> to vector<8x128xf32>
    %38 = vector.shape_cast %35 : vector<8x128xf32> to vector<1x8x128xf32>
    tpu.vector_store %arg4[%c3, %c0_18, %c0_19], %38 {strides = array<i32>} : memref<8x8x128xf32, #tpu.memory_space<vmem>>, vector<1x8x128xf32>,
    %39 = vector.extract_strided_slice %8 {offsets = [4, 0, 0], sizes = [1, 8, 128], strides = [1, 1, 1]} : vector<8x8x128xf32> to vector<1x8x128xf32>
    %40 = vector.shape_cast %39 : vector<1x8x128xf32> to vector<8x128xf32>
    %cst_20 = arith.constant dense<0.000000e+00> : vector<8x128xf32>
    %41 = tpu.matmul %35, %0, %cst_20 {dimension_numbers = #tpu.dot_dimension_numbers<[1], [0], [0], [1], [0, 0, 1, 1], [], []>, precision = #tpu.contract_precision<fp32>} : vector<8x128xf32>, vector<128x128xf32>, vector<8x128xf32> -> vector<8x128xf32>
    %42 = arith.addf %40, %41 : vector<8x128xf32>
    %43 = math.tanh %42 : vector<8x128xf32>
    %c4 = arith.constant 4 : index
    %c0_21 = arith.constant 0 : index
    %c0_22 = arith.constant 0 : index
    %44 = vector.load %arg4[%c4, %c0_21, %c0_22] : memref<8x8x128xf32, #tpu.memory_space<vmem>>, vector<1x8x128xf32>
    %45 = vector.shape_cast %44 : vector<1x8x128xf32> to vector<8x128xf32>
    %46 = vector.shape_cast %43 : vector<8x128xf32> to vector<1x8x128xf32>
    tpu.vector_store %arg4[%c4, %c0_21, %c0_22], %46 {strides = array<i32>} : memref<8x8x128xf32, #tpu.memory_space<vmem>>, vector<1x8x128xf32>,
    %47 = vector.extract_strided_slice %8 {offsets = [5, 0, 0], sizes = [1, 8, 128], strides = [1, 1, 1]} : vector<8x8x128xf32> to vector<1x8x128xf32>
    %48 = vector.shape_cast %47 : vector<1x8x128xf32> to vector<8x128xf32>
    %cst_23 = arith.constant dense<0.000000e+00> : vector<8x128xf32>
    %49 = tpu.matmul %43, %0, %cst_23 {dimension_numbers = #tpu.dot_dimension_numbers<[1], [0], [0], [1], [0, 0, 1, 1], [], []>, precision = #tpu.contract_precision<fp32>} : vector<8x128xf32>, vector<128x128xf32>, vector<8x128xf32> -> vector<8x128xf32>
    %50 = arith.addf %48, %49 : vector<8x128xf32>
    %51 = math.tanh %50 : vector<8x128xf32>
    %c5 = arith.constant 5 : index
    %c0_24 = arith.constant 0 : index
    %c0_25 = arith.constant 0 : index
    %52 = vector.load %arg4[%c5, %c0_24, %c0_25] : memref<8x8x128xf32, #tpu.memory_space<vmem>>, vector<1x8x128xf32>
    %53 = vector.shape_cast %52 : vector<1x8x128xf32> to vector<8x128xf32>
    %54 = vector.shape_cast %51 : vector<8x128xf32> to vector<1x8x128xf32>
    tpu.vector_store %arg4[%c5, %c0_24, %c0_25], %54 {strides = array<i32>} : memref<8x8x128xf32, #tpu.memory_space<vmem>>, vector<1x8x128xf32>,
    %55 = vector.extract_strided_slice %8 {offsets = [6, 0, 0], sizes = [1, 8, 128], strides = [1, 1, 1]} : vector<8x8x128xf32> to vector<1x8x128xf32>
    %56 = vector.shape_cast %55 : vector<1x8x128xf32> to vector<8x128xf32>
    %cst_26 = arith.constant dense<0.000000e+00> : vector<8x128xf32>
    %57 = tpu.matmul %51, %0, %cst_26 {dimension_numbers = #tpu.dot_dimension_numbers<[1], [0], [0], [1], [0, 0, 1, 1], [], []>, precision = #tpu.contract_precision<fp32>} : vector<8x128xf32>, vector<128x128xf32>, vector<8x128xf32> -> vector<8x128xf32>
    %58 = arith.addf %56, %57 : vector<8x128xf32>
    %59 = math.tanh %58 : vector<8x128xf32>
    %c6 = arith.constant 6 : index
    %c0_27 = arith.constant 0 : index
    %c0_28 = arith.constant 0 : index
    %60 = vector.load %arg4[%c6, %c0_27, %c0_28] : memref<8x8x128xf32, #tpu.memory_space<vmem>>, vector<1x8x128xf32>
    %61 = vector.shape_cast %60 : vector<1x8x128xf32> to vector<8x128xf32>
    %62 = vector.shape_cast %59 : vector<8x128xf32> to vector<1x8x128xf32>
    tpu.vector_store %arg4[%c6, %c0_27, %c0_28], %62 {strides = array<i32>} : memref<8x8x128xf32, #tpu.memory_space<vmem>>, vector<1x8x128xf32>,
    %63 = vector.extract_strided_slice %8 {offsets = [7, 0, 0], sizes = [1, 8, 128], strides = [1, 1, 1]} : vector<8x8x128xf32> to vector<1x8x128xf32>
    %64 = vector.shape_cast %63 : vector<1x8x128xf32> to vector<8x128xf32>
    %cst_29 = arith.constant dense<0.000000e+00> : vector<8x128xf32>
    %65 = tpu.matmul %59, %0, %cst_29 {dimension_numbers = #tpu.dot_dimension_numbers<[1], [0], [0], [1], [0, 0, 1, 1], [], []>, precision = #tpu.contract_precision<fp32>} : vector<8x128xf32>, vector<128x128xf32>, vector<8x128xf32> -> vector<8x128xf32>
    %66 = arith.addf %64, %65 : vector<8x128xf32>
    %67 = math.tanh %66 : vector<8x128xf32>
    %c7 = arith.constant 7 : index
    %c0_30 = arith.constant 0 : index
    %c0_31 = arith.constant 0 : index
    %68 = vector.load %arg4[%c7, %c0_30, %c0_31] : memref<8x8x128xf32, #tpu.memory_space<vmem>>, vector<1x8x128xf32>
    %69 = vector.shape_cast %68 : vector<1x8x128xf32> to vector<8x128xf32>
    %70 = vector.shape_cast %67 : vector<8x128xf32> to vector<1x8x128xf32>
    tpu.vector_store %arg4[%c7, %c0_30, %c0_31], %70 {strides = array<i32>} : memref<8x8x128xf32, #tpu.memory_space<vmem>>, vector<1x8x128xf32>,
    %c0_32 = arith.constant 0 : index
    %c0_33 = arith.constant 0 : index
    %71 = vector.load %arg5[%c0_32, %c0_33] : memref<8x128xf32, #tpu.memory_space<vmem>>, vector<8x128xf32>
    tpu.vector_store %arg5[%c0_32, %c0_33], %67 {strides = array<i32>} : memref<8x128xf32, #tpu.memory_space<vmem>>, vector<8x128xf32>,
    return
  }
}

</mosaic_0001>

<bundles_post_ra>
// kernel: rnn_forward_prepared.1
= control target key start
LH: loop header
LB: loop body
LE: loop exit
PB: predicated region body
PF: predicated region fallthrough
CT: control target
= control target key end

     0   :  { %11 = vsyncpa [#allocation3], 0  ;;  %s11131_s0 = inlined_call_operand.vmem [shape: f32[8,8,128], index: 0, kind: input, shape index: {}]   ;;  %s11132_s1 = inlined_call_operand.hbm [shape: f32[128,128], index: 1, kind: input, shape index: {}]   ;;  %s11133_s2 = inlined_call_operand.hbm [shape: f32[128,128], index: 2, kind: input, shape index: {}]   ;;  %s11134_s3 = inlined_call_operand.vmem [shape: f32[1,128], index: 3, kind: input, shape index: {}]   ;;  %s11135_s4 = inlined_call_operand.vmem [shape: f32[8,8,128], index: 4, kind: output, shape index: {0}]   ;;  %s11136_s5 = inlined_call_operand.vmem [shape: f32[8,128], index: 5, kind: output, shape index: {1}]  }
   0x1   :  { %12 = vsyncpa [#allocation5], 0  ;;  %s9553_s18 = smov [#allocation2]   ;;  %s9505_s22 = scalar_lea.hbm %s11132_s1, 2048 }
   0x2   :  { %s20_s19 = sshll.u32 %s9553_s18, 4  ;;  %p9506_p0 = scmp.ne.s32.totalorder %s11132_s1, %s9505_s22  ;;  %s21_s19 = int_to_ptr.vmem [resolvable:$true] %s20_s19 }
   0x3   :  { %p9509_p1 = scmp.lt.u32.totalorder %s9505_s22, %s11132_s1 }
   0x5   :  { %p9511_p2 = pnand %p9509_p1, %p9506_p0 }
   0x7   :  { %9514 = shalt.err (!%p9511_p2)
}
   0x8   :  { %s9515_s27 = scalar_lea.vmem %s21_s19, 2048  ;;  %p9520_p4 = scmp.lt.s32.totalorder %s21_s19, %s21_s19 }
   0x9   :  { %p9516_p3 = scmp.ne.s32.totalorder %s21_s19, %s9515_s27  ;;  %p9521_p5 = scmp.lt.s32.totalorder %s9515_s27, %s9515_s27 }
   0xb   :  { %p9522_p6 = por %p9521_p5, %p9520_p4 }
   0xd   :  { %p9523_p7 = pnand %p9522_p6, %p9516_p3 }
   0xf   :  { %9526 = shalt.err (!%p9523_p7)
}
  0x10   :  { %s9554_s28 = smov 128   ;;  %s9555_s29 = smov 8  }
  0x11   :  { %26 = dma.hbm_to_vmem [thread:$0]  %s11132_s1, 2048, %s21_s19, [#allocation3], %s9554_s28, %s9554_s28, %s9555_s29  }
  0x12   :  { %s9556_s7 = smov [#allocation4]   ;;  %s9527_s11 = scalar_lea.hbm %s11133_s2, 2048 }
  0x13   :  { %s32_s8 = sshll.u32 %s9556_s7, 4  ;;  %p9528_p8 = scmp.ne.s32.totalorder %s11133_s2, %s9527_s11  ;;  %s33_s8 = int_to_ptr.vmem [resolvable:$true] %s32_s8 }
  0x14   :  { %p9531_p9 = scmp.lt.u32.totalorder %s9527_s11, %s11133_s2 }
  0x16   :  { %p9533_p10 = pnand %p9531_p9, %p9528_p8 }
  0x18   :  { %9536 = shalt.err (!%p9533_p10)
}
  0x19   :  { %s9537_s16 = scalar_lea.vmem %s33_s8, 2048  ;;  %p9542_p12 = scmp.lt.s32.totalorder %s33_s8, %s33_s8 }
  0x1a   :  { %p9538_p11 = scmp.ne.s32.totalorder %s33_s8, %s9537_s16  ;;  %p9543_p13 = scmp.lt.s32.totalorder %s9537_s16, %s9537_s16 }
  0x1c   :  { %p9544_p0 = por %p9543_p13, %p9542_p12 }
  0x1e   :  { %p9545_p1 = pnand %p9544_p0, %p9538_p11 }
  0x20   :  { %9548 = shalt.err (!%p9545_p1)
}
  0x21   :  { %38 = dma.hbm_to_vmem [thread:$0]  %s11133_s2, 2048, %s33_s8, [#allocation5], %s9554_s28, %s9554_s28, %s9555_s29  }
  0x22   :  { %9549 = dma.done.wait [#allocation3], 2048  }
  0x23   :  { %9550 = vsyncadd [#allocation3], 4294965248 }
  0x24   :  { %9551 = dma.done.wait [#allocation5], 2048  }
  0x25   :  { %9552 = vsyncadd [#allocation5], 4294965248  ;;  %v72_v0 = vld [vmem:[#allocation2] sm:$0xff]  ;;  %v73_v1 = vld [vmem:[#allocation2 + $0x8] sm:$0xff]  ;;  %vm9558_vm0 = vmmov 0  }
  0x26   :  { %v74_v2 = vld [vmem:[#allocation2 + $0x10] sm:$0xff]  ;;  %v95_v3 = vand.u32 4294901760, %v72_v0  ;;  %v98_v4 = vand.u32 4294901760, %v73_v1  ;;  %v75_v5 = vld [vmem:[#allocation2 + $0x18] sm:$0xff]  ;;  %v76_v7 = vld [vmem:[#allocation2 + $0x20] sm:$0xff] }
  0x27   :  { %v101_v6 = vand.u32 4294901760, %v74_v2  ;;  %v77_v8 = vld [vmem:[#allocation2 + $0x28] sm:$0xff]  ;;  %v104_v9 = vand.u32 4294901760, %v75_v5  ;;  %v107_v11 = vand.u32 4294901760, %v76_v7  ;;  %v9618_v14 = vld [vmem:[#allocation2 + $0x30] sm:$0xff]  ;;  %v9620_v15 = vld [vmem:[#allocation2 + $0x38] sm:$0xff] }
  0x28   :  { %v9614_v10 = vpack.c.bf16 %v98_v4, %v95_v3  ;;  %v110_v12 = vand.u32 4294901760, %v77_v8  ;;  %v64_v16 = vld [vmem:[%s11131_s0] sm:$0xff]  ;;  %v113_v19 = vand.u32 4294901760, %v9618_v14  ;;  %v116_v20 = vand.u32 4294901760, %v9620_v15  ;;  %v9636_v22 = vld [vmem:[#allocation2 + $0x48] sm:$0xff]  ;;  %v9655_v30 = vld [vmem:[#allocation2 + $0x50] sm:$0xff] }
  0x29   :  { %v9616_v13 = vpack.c.bf16 %v104_v9, %v101_v6  ;;  %v9627_v17 = vand.u32 4294901760, %v64_v16  ;;  %v9634_v21 = vld [vmem:[#allocation2 + $0x40] sm:$0xff]  ;;  %v65_v24 = vld [vmem:[%s11131_s0 + $0x8] sm:$0xff]  ;;  %v122_v26 = vand.u32 4294901760, %v9636_v22  ;;  %v9648_v28 = vsub.f32 %v72_v0, %v95_v3  ;;  %v9657_v31 = vld [vmem:[#allocation2 + $0x58] sm:$0xff] }
  0x2a   :  { %8165 = vmatprep.subr.bf16.mxu0 %v9614_v10  ;;  %v9630_v18 = vpack.c.bf16 %v110_v12, %v107_v11  ;;  %v119_v25 = vand.u32 4294901760, %v9634_v21  ;;  %v9653_v29 = vpack.c.bf16 %v116_v20, %v113_v19  ;;  %v9659_v32 = vsub.f32 %v73_v1, %v98_v4  ;;  %v9685_v44 = vld [vmem:[#allocation2 + $0x60] sm:$0xff]  ;;  %v9687_v45 = vld [vmem:[#allocation2 + $0x68] sm:$0xff]  ;;  %v66_v49 = vld [vmem:[%s11131_s0 + $0x10] sm:$0xff] }
  0x2b   :  { %8167 = vmatpush3.bf16.msra.mxu0 %v9614_v10  ;;  %v9639_v23 = vsub.f32 %v64_v16, %v9627_v17  ;;  %v9661_v33 = vand.u32 4294901760, %v65_v24  ;;  %v9663_v34 = vsub.f32 %v74_v2, %v101_v6  ;;  %v9668_v36 = vsub.f32 %v75_v5, %v104_v9  ;;  %v67_v53 = vld [vmem:[%s11131_s0 + $0x18] sm:$0xff]  ;;  %v9706_v56 = vld [vmem:[#allocation2 + $0x70] sm:$0xff]  ;;  %v68_v4 = vld [vmem:[%s11131_s0 + $0x20] sm:$0xff] }
  0x2c   :  { %8169 = vmatprep.subr.bf16.mxu0 %v9616_v13  ;;  %11178 = vst [vmem:[#allocation8_spill] sm:$0xff] %v9630_v18  ;;  %11179 = vst [vmem:[#allocation9_spill] sm:$0xff] %v9653_v29  ;;  %v9670_v37 = vsub.f32 %v76_v7, %v107_v11  ;;  %v9672_v38 = vsub.f32 %v77_v8, %v110_v12  ;;  %v125_v39 = vand.u32 4294901760, %v9655_v30  ;;  %v128_v40 = vand.u32 4294901760, %v9657_v31  ;;  %v9708_v57 = vld [vmem:[#allocation2 + $0x78] sm:$0xff] }
  0x2d   :  { %v11137_v27 = vand.u32 4294901760, %v9639_v23  ;;  %v11146_v42 = vand.u32 4294901760, %v9648_v28  ;;  %v9683_v43 = vpack.c.bf16 %v122_v26, %v119_v25  ;;  %v11145_v46 = vand.u32 4294901760, %v9659_v32 }
  0x2e   :  { %v9691_v47 = vsub.f32 %v65_v24, %v9661_v33  ;;  %v11142_v48 = vand.u32 4294901760, %v9663_v34  ;;  %v11141_v50 = vand.u32 4294901760, %v9668_v36  ;;  %v11140_v51 = vand.u32 4294901760, %v9670_v37 }
  0x2f   :  { %8171 = vmatpush3.bf16.msra.mxu0 %v9616_v13  ;;  %v178_v35 = vsub.f32 %v9639_v23, %v11137_v27  ;;  %11180 = vst [vmem:[#allocation10_spill] sm:$0xff] %v9683_v43  ;;  %v11139_v52 = vand.u32 4294901760, %v9672_v38  ;;  %v131_v54 = vand.u32 4294901760, %v9685_v44  ;;  %v134_v55 = vand.u32 4294901760, %v9687_v45 }
  0x30   :  { %8173 = vmatprep.subr.bf16.mxu0 %v9630_v18  ;;  %v259_v58 = vsub.f32 %v9648_v28, %v11146_v42  ;;  %v9713_v59 = vand.u32 4294901760, %v66_v49  ;;  %v9720_v60 = vpack.c.bf16 %v128_v40, %v125_v39  ;;  %v266_v61 = vsub.f32 %v9659_v32, %v11145_v46 }
  0x31   :  { %v179_v41 = vand.u32 4294901760, %v178_v35  ;;  %v11138_v62 = vand.u32 4294901760, %v9691_v47  ;;  %v273_v63 = vsub.f32 %v9663_v34, %v11142_v48  ;;  %v280_v0 = vsub.f32 %v9668_v36, %v11141_v50 }
  0x32   :  { %11181 = vst [vmem:[#allocation11_spill] sm:$0xff] %v9720_v60  ;;  %v287_v1 = vsub.f32 %v9670_v37, %v11140_v51  ;;  %v294_v2 = vsub.f32 %v9672_v38, %v11139_v52  ;;  %v9738_v3 = vand.u32 4294901760, %v67_v53  ;;  %v137_v5 = vand.u32 4294901760, %v9706_v56 }
  0x33   :  { %8175 = vmatpush3.bf16.msra.mxu0 %v9630_v18  ;;  %6462 = vmatprep.mubr.f32.mxu0 %v179_v41  ;;  %v140_v6 = vand.u32 4294901760, %v9708_v57  ;;  %v9750_v7 = vpack.c.bf16 %v134_v55, %v131_v54  ;;  %v260_v8 = vand.u32 4294901760, %v259_v58  ;;  %v9753_v9 = vsub.f32 %v9618_v14, %v113_v19  ;;  %v69_v14 = vld [vmem:[%s11131_s0 + $0x28] sm:$0xff] }
  0x34   :  { %8177 = vmatprep.subr.bf16.mxu0 %v9653_v29  ;;  %v9756_v11 = vsub.f32 %v66_v49, %v9713_v59  ;;  %v267_v12 = vand.u32 4294901760, %v266_v61  ;;  %v9762_v16 = vsub.f32 %v9691_v47, %v11138_v62  ;;  %v9765_v24 = vsub.f32 %v67_v53, %v9738_v3  ;;  %v70_v61 = vld [vmem:[%s11131_s0 + $0x30] sm:$0xff] }
  0x35   :  { %11182 = vst [vmem:[#allocation12_spill] sm:$0xff] %v9750_v7  ;;  %v9767_v35 = vand.u32 4294901760, %v68_v4  ;;  %v274_v19 = vand.u32 4294901760, %v273_v63  ;;  %v281_v41 = vand.u32 4294901760, %v280_v0  ;;  %v288_v49 = vand.u32 4294901760, %v287_v1 }
  0x36   :  { %v295_v58 = vand.u32 4294901760, %v294_v2  ;;  %v9775_v27 = vpack.c.bf16 %v140_v6, %v137_v5  ;;  %v9780_v53 = vsub.f32 %v9620_v15, %v116_v20  ;;  %v9785_v62 = vsub.f32 %v9634_v21, %v119_v25  ;;  %v71_v25 = vld [vmem:[%s11131_s0 + $0x38] sm:$0xff] }
  0x37   :  { %8179 = vmatpush3.bf16.msra.mxu0 %v9653_v29  ;;  %v300_v63 = vand.u32 4294901760, %v9753_v9  ;;  %v11143_v0 = vand.u32 4294901760, %v9756_v11  ;;  %v9791_v1 = vsub.f32 %v68_v4, %v9767_v35  ;;  %v9793_v2 = vand.u32 4294901760, %v69_v14 }
  0x38   :  { %8181 = vmatprep.subr.bf16.mxu0 %v9683_v43  ;;  %11183 = vst [vmem:[#allocation13_spill] sm:$0xff] %v9775_v27  ;;  %v8196_v15 = vpack.c.bf16 %v267_v12, %v260_v8  ;;  %v189_v20 = vand.u32 4294901760, %v9762_v16  ;;  %v11144_v52 = vand.u32 4294901760, %v9765_v24  ;;  %v9798_v21 = vand.u32 4294901760, %v70_v61 }
  0x39   :  { %11184 = vst [vmem:[#allocation14_spill] sm:$0xff] %v9791_v1  ;;  %v8200_v51 = vpack.c.bf16 %v281_v41, %v274_v19  ;;  %v9803_v50 = vpack.c.bf16 %v295_v58, %v288_v49  ;;  %v9808_v4 = vsub.f32 %v9636_v22, %v122_v26  ;;  %v9811_v8 = vsub.f32 %v69_v14, %v9793_v2 }
  0x3a   :  { %v307_v12 = vand.u32 4294901760, %v9780_v53  ;;  %v314_v16 = vand.u32 4294901760, %v9785_v62  ;;  %v9818_v48 = vsub.f32 %v9655_v30, %v125_v39  ;;  %v9821_v19 = vsub.f32 %v70_v61, %v9798_v21 }
  0x3b   :  { %8183 = vmatpush3.bf16.msra.mxu0 %v9683_v43  ;;  %11185 = vst [vmem:[#allocation15_spill] sm:$0xff] %v9811_v8  ;;  %v301_v22 = vsub.f32 %v9753_v9, %v300_v63  ;;  %v198_v26 = vsub.f32 %v9756_v11, %v11143_v0  ;;  %v11149_v14 = vand.u32 4294901760, %v9791_v1  ;;  %v9829_v41 = vand.u32 4294901760, %v71_v25 }
  0x3c   :  { %8185 = vmatprep.subr.bf16.mxu0 %v9720_v60  ;;  %11186 = vst [vmem:[#allocation16_spill] sm:$0xff] %v9821_v19  ;;  %v9835_v30 = vsub.f32 %v9657_v31, %v128_v40  ;;  %v208_v39 = vsub.f32 %v9765_v24, %v11144_v52  ;;  %v9843_v49 = vsub.f32 %v9685_v44, %v131_v54  ;;  %v11158_v61 = vand.u32 4294901760, %v9811_v8 }
  0x3d   :  { %v9848_v58 = vsub.f32 %v9687_v45, %v134_v55  ;;  %v9853_v31 = vsub.f32 %v9706_v56, %v137_v5  ;;  %v9856_v40 = vsub.f32 %v9708_v57, %v140_v6  ;;  %v308_v52 = vsub.f32 %v9780_v53, %v307_v12 }
  0x3e   :  { %v315_v44 = vsub.f32 %v9785_v62, %v314_v16  ;;  %v321_v54 = vand.u32 4294901760, %v9808_v4  ;;  %v9862_v46 = vsub.f32 %v71_v25, %v9829_v41  ;;  %v302_v45 = vand.u32 4294901760, %v301_v22 }
  0x3f   :  { %8187 = vmatpush3.bf16.msra.mxu0 %v9720_v60  ;;  %v199_v55 = vand.u32 4294901760, %v198_v26  ;;  %v328_v42 = vand.u32 4294901760, %v9818_v48  ;;  %v218_v56 = vsub.f32 %v9791_v1, %v11149_v14  ;;  %v335_v57 = vand.u32 4294901760, %v9835_v30 }
  0x40   :  { %8189 = vmatprep.subr.bf16.mxu0 %v9750_v7  ;;  %v209_v5 = vand.u32 4294901760, %v208_v39  ;;  %v342_v6 = vand.u32 4294901760, %v9843_v49  ;;  %v349_v0 = vand.u32 4294901760, %v9848_v58  ;;  %v228_v25 = vsub.f32 %v9811_v8, %v11158_v61 }
  0x41   :  { %v11187_v22 = vand.u32 4294901760, %v9821_v19  ;;  %v363_v14 = vand.u32 4294901760, %v9856_v40  ;;  %v11188_v39 = vand.u32 4294901760, %v9648_v28  ;;  %v11189_v60 = vand.u32 4294901760, %v9659_v32 }
  0x42   :  { %v11190_v29 = vand.u32 4294901760, %v9663_v34  ;;  %v11191_v61 = vand.u32 4294901760, %v9668_v36  ;;  %v9901_v1 = vpack.c.bf16 %v321_v54, %v314_v16 }
  0x43   :  { %8191 = vmatpush3.bf16.msra.mxu0 %v9750_v7  ;;  %v238_v26 = vsub.f32 %v9821_v19, %v11187_v22  ;;  %v9885_v43 = vpack.c.bf16 %v11189_v60, %v11188_v39  ;;  %v11193_v22 = vand.u32 4294901760, %v9670_v37  ;;  %v11194_v19 = vand.u32 4294901760, %v9672_v38 }
  0x44   :  { %8193 = vmatprep.subr.bf16.mxu0 %v9775_v27  ;;  %v9891_v8 = vpack.c.bf16 %v11191_v61, %v11190_v29  ;;  %v9899_v7 = vpack.c.bf16 %v307_v12, %v300_v63  ;;  %v9903_v60 = vpack.c.bf16 %v335_v57, %v328_v42  ;;  %v309_v39 = vand.u32 4294901760, %v308_v52 }
  0x45   :  { %v9897_v18 = vpack.c.bf16 %v11194_v19, %v11193_v22  ;;  %v322_v29 = vsub.f32 %v9808_v4, %v321_v54  ;;  %v9906_v61 = vpack.c.bf16 %v349_v0, %v342_v6  ;;  %v229_v19 = vand.u32 4294901760, %v228_v25 }
  0x46   :  { %11192 = vst [vmem:[#allocation17_spill] sm:$0xff] %v9891_v8  ;;  %v329_v63 = vsub.f32 %v9818_v48, %v328_v42  ;;  %v336_v12 = vsub.f32 %v9835_v30, %v335_v57  ;;  %v239_v16 = vand.u32 4294901760, %v238_v26  ;;  %v8208_v52 = vpack.c.bf16 %v309_v39, %v302_v45 }
  0x47   :  { %8195 = vmatpush3.bf16.msra.mxu0 %v9775_v27  ;;  %v356_v27 = vand.u32 4294901760, %v9853_v31  ;;  %v316_v54 = vand.u32 4294901760, %v315_v44  ;;  %v343_v42 = vsub.f32 %v9843_v49, %v342_v6  ;;  %v350_v57 = vsub.f32 %v9848_v58, %v349_v0 }
  0x48   :  { %8197 = vmatprep.subr.bf16.mxu0 %v8196_v15  ;;  %v337_v25 = vand.u32 4294901760, %v336_v12  ;;  %v8228_v6 = vpack.c.bf16 %v9659_v32, %v9648_v28  ;;  %v8240_v28 = vpack.c.bf16 %v9780_v53, %v9753_v9  ;;  %v8244_v32 = vpack.c.bf16 %v9808_v4, %v9785_v62  ;;  %v9948_v53 = vld [vmem:[#allocation4 + $0x18] sm:$0xff] }
  0x49   :  { %v9908_v8 = vpack.c.bf16 %v363_v14, %v356_v27  ;;  %v344_v44 = vand.u32 4294901760, %v343_v42  ;;  %v351_v45 = vand.u32 4294901760, %v350_v57  ;;  %v8248_v62 = vpack.c.bf16 %v9835_v30, %v9818_v48 }
  0x4a   :  { %6463 = vmatmul.mubr.f32.vlgmr.msra.gmra.mrb[0].mxu0 %v189_v20  ;;  %v219_v20 = vand.u32 4294901760, %v218_v56  ;;  %v323_v56 = vand.u32 4294901760, %v322_v29  ;;  %v9557_v4 = vmov 0.0|0.0   ;;  %v8252_v48 = vpack.c.bf16 %v9848_v58, %v9843_v49  ;;  %v11196_v49 = vld [vmem:[#allocation14_spill] sm:$0xff]  ;;  %v11197_v58 = vld [vmem:[#allocation8_spill] sm:$0xff] }
  0x4b   :  { %8199 = vmatpush3.bf16.msra.mxu0 %v8196_v15  ;;  %6465 = vmatprep.mubr.f32.mxu0 %v199_v55  ;;  %v11195_v15 = vand.u32 4294901760, %v9862_v46  ;;  %v8220_v39 = vpack.c.bf16 %v351_v45, %v344_v44  ;;  %v8256_v30 = vpack.c.bf16 %v9856_v40, %v9853_v31  ;;  %v11209_v42 = vand.u32 4294901760, %v9765_v24  ;;  %v59_v45 = vld [vmem:[#allocation4 + $0x60] sm:$0xff] }
  0x4c   :  { %8201 = vmatprep.subr.bf16.mxu0 %v8200_v51  ;;  %8356 = vmatprep.subr.bf16.mxu1 %v9557_v4  ;;  %v11210_v57 = vand.u32 4294901760, %v11196_v49 }
  0x4d   :  { %v248_v55 = vsub.f32 %v9862_v46, %v11195_v15 }
  0x4e   :  { %6466 = vmatmul.mubr.f32.gmra.mrb[2].mxu0 %v209_v5  ;;  %v330_v5 = vand.u32 4294901760, %v329_v63 }
  0x4f   :  { %8203 = vmatpush3.bf16.msra.mxu0 %v8200_v51  ;;  %6468 = vmatprep.mubr.f32.mxu0 %v219_v20  ;;  %v249_v22 = vand.u32 4294901760, %v248_v55  ;;  %v8212_v51 = vpack.c.bf16 %v323_v56, %v316_v54  ;;  %v357_v20 = vsub.f32 %v9853_v31, %v356_v27  ;;  %v8232_v27 = vpack.c.bf16 %v9668_v36, %v9663_v34  ;;  %v9939_v34 = vld [vmem:[#allocation4] sm:$0xff]  ;;  %v9941_v36 = vld [vmem:[#allocation4 + $0x8] sm:$0xff]  ;;  %v11198_v31 = vld [vmem:[#allocation15_spill] sm:$0xff] }
  0x50   :  { %8205 = vmatprep.subr.bf16.mxu0 %v9803_v50  ;;  %v8216_v26 = vpack.c.bf16 %v337_v25, %v330_v5  ;;  %v1042_v9 = vand.u32 4294901760, %v9941_v36  ;;  %v1048_v55 = vand.u32 4294901760, %v9948_v53  ;;  %v11202_v54 = vld [vmem:[#allocation10_spill] sm:$0xff]  ;;  %v11203_v56 = vld [vmem:[#allocation11_spill] sm:$0xff]  ;;  %v11205_v5 = vld [vmem:[#allocation13_spill] sm:$0xff]  ;;  %v11207_v25 = vand.u32 4294901760, %v9756_v11 }
  0x51   :  { %v358_v29 = vand.u32 4294901760, %v357_v20  ;;  %v60_v20 = vld [vmem:[#allocation4 + $0x68] sm:$0xff] }
  0x52   :  { %6469 = vmatmul.mubr.f32.gmra.mrb[4].mxu0 %v229_v19 }
  0x53   :  { %8207 = vmatpush3.bf16.msra.mxu0 %v9803_v50  ;;  %6471 = vmatprep.mubr.f32.mxu0 %v239_v16  ;;  %v364_v50 = vsub.f32 %v9856_v40, %v363_v14  ;;  %v8236_v14 = vpack.c.bf16 %v9672_v38, %v9670_v37  ;;  %v9943_v37 = vld [vmem:[#allocation4 + $0x10] sm:$0xff]  ;;  %v1039_v38 = vand.u32 4294901760, %v9939_v34  ;;  %v11199_v40 = vld [vmem:[#allocation16_spill] sm:$0xff]  ;;  %v11200_v16 = vld [vmem:[#allocation9_spill] sm:$0xff] }
  0x54   :  { %8209 = vmatprep.subr.bf16.mxu0 %v8208_v52  ;;  %v1045_v15 = vand.u32 4294901760, %v9943_v37 }
  0x55   :  { %v365_v19 = vand.u32 4294901760, %v364_v50  ;;  %v9959_v63 = vpack.c.bf16 %v1042_v9, %v1039_v38  ;;  %v1075_v50 = vand.u32 4294901760, %v59_v45 }
  0x56   :  { %6472 = vmatmul.mubr.f32.gmra.mrb[6].mxu0 %v249_v22  ;;  %v9966_v12 = vpack.c.bf16 %v1048_v55, %v1045_v15  ;;  %v11204_v22 = vld [vmem:[#allocation12_spill] sm:$0xff] }
  0x57   :  { %8211 = vmatpush3.bf16.msra.mxu0 %v8208_v52  ;;  %6506 = vmatprep.mubr.f32.mxu0 %v9627_v17  ;;  %v8224_v0 = vpack.c.bf16 %v365_v19, %v358_v29  ;;  %v11201_v52 = vand.u32 4294901760, %v9639_v23  ;;  %v61_v19 = vld [vmem:[#allocation4 + $0x70] sm:$0xff] }
  0x58   :  { %8213 = vmatprep.subr.bf16.mxu0 %v8212_v51  ;;  %8358 = vmatpush3.bf16.msra.mxu1 %v9959_v63 }
  0x59   :  { %8359 = vmatprep.subr.bf16.mxu1 %v9557_v4 }
  0x5b   :  { %8215 = vmatpush3.bf16.msra.mxu0 %v8212_v51  ;;  %v11208_v51 = vld [vmem:[#allocation17_spill] sm:$0xff] }
  0x5c   :  { %8217 = vmatprep.subr.bf16.mxu0 %v8216_v26  ;;  %8361 = vmatpush3.bf16.msra.mxu1 %v9966_v12 }
  0x5d   :  { %8362 = vmatprep.subr.bf16.mxu1 %v9557_v4 }
  0x5f   :  { %8219 = vmatpush3.bf16.msra.mxu0 %v8216_v26 }
  0x60   :  { %8221 = vmatprep.subr.bf16.mxu0 %v8220_v39 }
  0x63   :  { %8223 = vmatpush3.bf16.msra.mxu0 %v8220_v39  ;;  %v1078_v39 = vand.u32 4294901760, %v60_v20 }
  0x64   :  { %8225 = vmatprep.subr.bf16.mxu0 %v8224_v0 }
  0x65   :  { %v10091_v29 = vpack.c.bf16 %v1078_v39, %v1075_v50 }
  0x67   :  { %8227 = vmatpush3.bf16.msra.mxu0 %v8224_v0  ;;  %v62_v0 = vld [vmem:[#allocation4 + $0x78] sm:$0xff] }
  0x68   :  { %8229 = vmatprep.subr.bf16.mxu0 %v8228_v6 }
  0x6a   :  { %6507 = vmatmul.mubr.f32.vlgmr.msra.gmra.mrb[0].mxu0 %v9661_v33 }
  0x6b   :  { %8231 = vmatpush3.bf16.msra.mxu0 %v8228_v6  ;;  %6509 = vmatprep.mubr.f32.mxu0 %v9713_v59  ;;  %v1081_v6 = vand.u32 4294901760, %v61_v19 }
  0x6c   :  { %8233 = vmatprep.subr.bf16.mxu0 %v8232_v27 }
  0x6e   :  { %6510 = vmatmul.mubr.f32.gmra.mrb[2].mxu0 %v9738_v3 }
  0x6f   :  { %8235 = vmatpush3.bf16.msra.mxu0 %v8232_v27  ;;  %6512 = vmatprep.mubr.f32.mxu0 %v9767_v35  ;;  %v1084_v27 = vand.u32 4294901760, %v62_v0 }
  0x70   :  { %8237 = vmatprep.subr.bf16.mxu0 %v8236_v14 }
  0x72   :  { %6513 = vmatmul.mubr.f32.gmra.mrb[4].mxu0 %v9793_v2 }
  0x73   :  { %8239 = vmatpush3.bf16.msra.mxu0 %v8236_v14  ;;  %6515 = vmatprep.mubr.f32.mxu0 %v9798_v21  ;;  %v9559_v14 = vmov 0.0  }
  0x74   :  { %8241 = vmatprep.subr.bf16.mxu0 %v8240_v28  ;;  %6726 = vmatprep.mubr.msk.f32.mxu1 %vm9558_vm0, %v9559_v14 }
  0x76   :  { %6516 = vmatmul.mubr.f32.gmra.mrb[6].mxu0 %v9829_v41 }
  0x77   :  { %8243 = vmatpush3.bf16.msra.mxu0 %v8240_v28  ;;  %6550 = vmatprep.mubr.f32.mxu0 %v9639_v23  ;;  %v11206_v23 = vand.u32 4294901760, %v9691_v47  ;;  %v10100_v28 = vpack.c.bf16 %v1084_v27, %v1081_v6 }
  0x78   :  { %8245 = vmatprep.subr.bf16.mxu0 %v8244_v32 }
  0x7b   :  { %8247 = vmatpush3.bf16.msra.mxu0 %v8244_v32 }
  0x7c   :  { %8249 = vmatprep.subr.bf16.mxu0 %v8248_v62 }
  0x7f   :  { %8251 = vmatpush3.bf16.msra.mxu0 %v8248_v62 }
  0x80   :  { %8253 = vmatprep.subr.bf16.mxu0 %v8252_v48 }
  0x83   :  { %8255 = vmatpush3.bf16.msra.mxu0 %v8252_v48 }
  0x84   :  { %8257 = vmatprep.subr.bf16.mxu0 %v8256_v30 }
  0x87   :  { %8259 = vmatpush3.bf16.msra.mxu0 %v8256_v30 }
  0x88   :  { %8261 = vmatprep.subr.bf16.mxu0 %v9614_v10 }
  0x8a   :  { %6551 = vmatmul.mubr.f32.vlgmr.msra.gmra.mrb[0].mxu0 %v9691_v47  ;;  %v11211_v47 = vand.u32 4294901760, %v11198_v31 }
  0x8b   :  { %8263 = vmatpush3.bf16.msra.mxu0 %v9614_v10  ;;  %6553 = vmatprep.mubr.f32.mxu0 %v9756_v11  ;;  %v11213_v11 = vand.u32 4294901760, %v9862_v46 }
  0x8c   :  { %8265 = vmatprep.subr.bf16.mxu0 %v9616_v13 }
  0x8e   :  { %6554 = vmatmul.mubr.f32.gmra.mrb[2].mxu0 %v9765_v24 }
  0x8f   :  { %8267 = vmatpush3.bf16.msra.mxu0 %v9616_v13  ;;  %6556 = vmatprep.mubr.f32.mxu0 %v11196_v49 }
  0x90   :  { %8269 = vmatprep.subr.bf16.mxu0 %v11197_v58 }
  0x92   :  { %6557 = vmatmul.mubr.f32.gmra.mrb[4].mxu0 %v11198_v31 }
  0x93   :  { %8271 = vmatpush3.bf16.msra.mxu0 %v11197_v58  ;;  %6559 = vmatprep.mubr.f32.mxu0 %v11199_v40 }
  0x94   :  { %8273 = vmatprep.subr.bf16.mxu0 %v11200_v16 }
  0x96   :  { %6560 = vmatmul.mubr.f32.gmra.mrb[6].mxu0 %v9862_v46  ;;  %v53_v46 = vld [vmem:[#allocation4 + $0x30] sm:$0xff] }
  0x97   :  { %8275 = vmatpush3.bf16.msra.mxu0 %v11200_v16  ;;  %6594 = vmatprep.mubr.f32.mxu0 %v11201_v52 }
  0x98   :  { %8277 = vmatprep.subr.bf16.mxu0 %v11202_v54 }
  0x9b   :  { %8279 = vmatpush3.bf16.msra.mxu0 %v11202_v54 }
  0x9c   :  { %8281 = vmatprep.subr.bf16.mxu0 %v11203_v56 }
  0x9f   :  { %8283 = vmatpush3.bf16.msra.mxu0 %v11203_v56 }
  0xa0   :  { %8285 = vmatprep.subr.bf16.mxu0 %v11204_v22 }
  0xa3   :  { %8287 = vmatpush3.bf16.msra.mxu0 %v11204_v22 }
  0xa4   :  { %8289 = vmatprep.subr.bf16.mxu0 %v11205_v5 }
  0xa7   :  { %8291 = vmatpush3.bf16.msra.mxu0 %v11205_v5 }
  0xa8   :  { %8293 = vmatprep.subr.bf16.mxu0 %v9885_v43 }
  0xaa   :  { %6595 = vmatmul.mubr.f32.vlgmr.msra.gmra.mrb[0].mxu0 %v11206_v23 }
  0xab   :  { %8295 = vmatpush3.bf16.msra.mxu0 %v9885_v43  ;;  %6597 = vmatprep.mubr.f32.mxu0 %v11207_v25  ;;  %v11212_v43 = vand.u32 4294901760, %v11199_v40 }
  0xac   :  { %8297 = vmatprep.subr.bf16.mxu0 %v11208_v51 }
  0xae   :  { %6598 = vmatmul.mubr.f32.gmra.mrb[2].mxu0 %v11209_v42 }
  0xaf   :  { %8299 = vmatpush3.bf16.msra.mxu0 %v11208_v51  ;;  %6600 = vmatprep.mubr.f32.mxu0 %v11210_v57 }
  0xb0   :  { %8301 = vmatprep.subr.bf16.mxu0 %v9897_v18 }
  0xb2   :  { %6601 = vmatmul.mubr.f32.gmra.mrb[4].mxu0 %v11211_v47 }
  0xb3   :  { %8303 = vmatpush3.bf16.msra.mxu0 %v9897_v18  ;;  %6603 = vmatprep.mubr.f32.mxu0 %v11212_v43 }
  0xb4   :  { %8305 = vmatprep.subr.bf16.mxu0 %v9899_v7 }
  0xb6   :  { %6604 = vmatmul.mubr.f32.gmra.mrb[6].mxu0 %v11213_v11 }
  0xb7   :  { %8307 = vmatpush3.bf16.msra.mxu0 %v9899_v7  ;;  %6638 = vmatprep.mubr.f32.mxu0 %v9627_v17 }
  0xb8   :  { %8309 = vmatprep.subr.bf16.mxu0 %v9901_v1 }
  0xbb   :  { %8311 = vmatpush3.bf16.msra.mxu0 %v9901_v1  ;;  %v56_v1 = vld [vmem:[#allocation4 + $0x48] sm:$0xff] }
  0xbc   :  { %8313 = vmatprep.subr.bf16.mxu0 %v9903_v60 }
  0xbf   :  { %8315 = vmatpush3.bf16.msra.mxu0 %v9903_v60  ;;  %v58_v60 = vld [vmem:[#allocation4 + $0x58] sm:$0xff] }
  0xc0   :  { %8317 = vmatprep.subr.bf16.mxu0 %v9906_v61  ;;  %v1072_v26 = vand.u32 4294901760, %v58_v60 }
  0xc3   :  { %8319 = vmatpush3.bf16.msra.mxu0 %v9906_v61 }
  0xc4   :  { %8321 = vmatprep.subr.bf16.mxu0 %v9908_v8 }
  0xc7   :  { %8323 = vmatpush3.bf16.msra.mxu0 %v9908_v8 }
  0xc8   :  { %8325 = vmatprep.subr.bf16.mxu0 %v9614_v10 }
  0xca   :  { %6639 = vmatmul.mubr.f32.vlgmr.msra.gmra.mrb[0].mxu0 %v9661_v33 }
  0xcb   :  { %8327 = vmatpush3.bf16.msra.mxu0 %v9614_v10  ;;  %6641 = vmatprep.mubr.f32.mxu0 %v9713_v59  ;;  %v51_v10 = vld [vmem:[#allocation4 + $0x20] sm:$0xff] }
  0xcc   :  { %8329 = vmatprep.subr.bf16.mxu0 %v9616_v13 }
  0xce   :  { %6642 = vmatmul.mubr.f32.gmra.mrb[2].mxu0 %v9738_v3 }
  0xcf   :  { %8331 = vmatpush3.bf16.msra.mxu0 %v9616_v13  ;;  %6644 = vmatprep.mubr.f32.mxu0 %v9767_v35  ;;  %v52_v13 = vld [vmem:[#allocation4 + $0x28] sm:$0xff] }
  0xd0   :  { %8333 = vmatprep.subr.bf16.mxu0 %v11197_v58  ;;  %v1054_v18 = vand.u32 4294901760, %v52_v13 }
  0xd2   :  { %6645 = vmatmul.mubr.f32.gmra.mrb[4].mxu0 %v9793_v2  ;;  %v10109_v62 = vsub.f32 %v52_v13, %v1054_v18 }
  0xd3   :  { %8335 = vmatpush3.bf16.msra.mxu0 %v11197_v58  ;;  %6647 = vmatprep.mubr.f32.mxu0 %v9798_v21 }
  0xd4   :  { %8337 = vmatprep.subr.bf16.mxu0 %v11200_v16  ;;  %v1167_v30 = vand.u32 4294901760, %v10109_v62 }
  0xd6   :  { %6648 = vmatmul.mubr.f32.gmra.mrb[6].mxu0 %v9829_v41  ;;  %v1168_v40 = vsub.f32 %v10109_v62, %v1167_v30 }
  0xd7   :  { %8339 = vmatpush3.bf16.msra.mxu0 %v11200_v16  ;;  %6682 = vmatprep.mubr.f32.mxu0 %v9627_v17  ;;  %v1051_v17 = vand.u32 4294901760, %v51_v10 }
  0xd8   :  { %8341 = vmatprep.subr.bf16.mxu0 %v11202_v54 }
  0xd9   :  { %v10107_v32 = vsub.f32 %v51_v10, %v1051_v17 }
  0xdb   :  { %8343 = vmatpush3.bf16.msra.mxu0 %v11202_v54  ;;  %v1160_v48 = vand.u32 4294901760, %v10107_v32 }
  0xdc   :  { %8345 = vmatprep.subr.bf16.mxu0 %v11203_v56 }
  0xdd   :  { %v1161_v49 = vsub.f32 %v10107_v32, %v1160_v48 }
  0xdf   :  { %8347 = vmatpush3.bf16.msra.mxu0 %v11203_v56  ;;  %v1162_v16 = vand.u32 4294901760, %v1161_v49  ;;  %v1169_v56 = vand.u32 4294901760, %v1168_v40 }
  0xe0   :  { %8349 = vmatprep.subr.bf16.mxu0 %v11204_v22 }
  0xe1   :  { %v10135_v51 = vpack.c.bf16 %v1169_v56, %v1162_v16 }
  0xe3   :  { %8351 = vmatpush3.bf16.msra.mxu0 %v11204_v22 }
  0xe4   :  { %8353 = vmatprep.subr.bf16.mxu0 %v11205_v5 }
  0xe7   :  { %8355 = vmatpush3.bf16.msra.mxu0 %v11205_v5 }
  0xe8   :  { %8500 = vmatprep.subr.bf16.mxu0 %v9557_v4 }
  0xea   :  { %6683 = vmatmul.mubr.f32.vlgmr.msra.gmra.mrb[0].mxu0 %v9661_v33  ;;  %v10067_v33 = vpack.c.bf16 %v1054_v18, %v1051_v17  ;;  %v10149_v18 = vsub.f32 %v58_v60, %v1072_v26 }
  0xeb   :  { %6685 = vmatprep.mubr.f32.mxu0 %v9713_v59  ;;  %8502 = vmatpush3.bf16.msra.mxu0 %v9959_v63  ;;  %v54_v59 = vld [vmem:[#allocation4 + $0x38] sm:$0xff] }
  0xec   :  { %8503 = vmatprep.subr.bf16.mxu0 %v9557_v4  ;;  %8364 = vmatpush3.bf16.msra.mxu1 %v10067_v33  ;;  %v1060_v7 = vand.u32 4294901760, %v54_v59 }
  0xed   :  { %8365 = vmatprep.subr.bf16.mxu1 %v9557_v4 }
  0xee   :  { %6686 = vmatmul.mubr.f32.gmra.mrb[2].mxu0 %v9738_v3  ;;  %v1057_v3 = vand.u32 4294901760, %v53_v46  ;;  %v10118_v31 = vsub.f32 %v54_v59, %v1060_v7 }
  0xef   :  { %6688 = vmatprep.mubr.f32.mxu0 %v9767_v35  ;;  %8505 = vmatpush3.bf16.msra.mxu0 %v9966_v12  ;;  %v55_v35 = vld [vmem:[#allocation4 + $0x40] sm:$0xff] }
  0xf0   :  { %8506 = vmatprep.subr.bf16.mxu0 %v9557_v4  ;;  %v10073_v24 = vpack.c.bf16 %v1060_v7, %v1057_v3  ;;  %v10116_v58 = vsub.f32 %v53_v46, %v1057_v3  ;;  %v11176_v54 = vand.u32 4294901760, %v10118_v31  ;;  %v11172_v7 = vand.u32 4294901760, %v10149_v18 }
  0xf2   :  { %6689 = vmatmul.mubr.f32.gmra.mrb[4].mxu0 %v9793_v2  ;;  %8367 = vmatpush3.bf16.msra.mxu1 %v10073_v24  ;;  %v1063_v2 = vand.u32 4294901760, %v55_v35  ;;  %v11177_v52 = vand.u32 4294901760, %v10116_v58  ;;  %v1182_v5 = vsub.f32 %v10118_v31, %v11176_v54 }
  0xf3   :  { %6691 = vmatprep.mubr.f32.mxu0 %v9798_v21  ;;  %8508 = vmatpush3.bf16.msra.mxu0 %v10067_v33  ;;  %v1066_v21 = vand.u32 4294901760, %v56_v1 }
  0xf4   :  { %8509 = vmatprep.subr.bf16.mxu0 %v9557_v4  ;;  %8368 = vmatprep.subr.bf16.mxu1 %v9557_v4  ;;  %v1175_v22 = vsub.f32 %v10116_v58, %v11177_v52  ;;  %v10131_v23 = vsub.f32 %v55_v35, %v1063_v2  ;;  %v1183_v57 = vand.u32 4294901760, %v1182_v5 }
  0xf5   :  { %v10079_v8 = vpack.c.bf16 %v1066_v21, %v1063_v2  ;;  %v10133_v25 = vsub.f32 %v56_v1, %v1066_v21  ;;  %v10158_v2 = vsub.f32 %v59_v45, %v1075_v50  ;;  %v10160_v21 = vsub.f32 %v60_v20, %v1078_v39 }
  0xf6   :  { %6692 = vmatmul.mubr.f32.gmra.mrb[6].mxu0 %v9829_v41  ;;  %v57_v41 = vld [vmem:[#allocation4 + $0x50] sm:$0xff]  ;;  %v1176_v42 = vand.u32 4294901760, %v1175_v22  ;;  %v11175_v47 = vand.u32 4294901760, %v10131_v23  ;;  %v10173_v20 = vsub.f32 %v61_v19, %v1081_v6  ;;  %v10175_v50 = vsub.f32 %v62_v0, %v1084_v27 }
  0xf7   :  { %8511 = vmatpush3.bf16.msra.mxu0 %v10073_v24  ;;  %8370 = vmatpush3.bf16.msra.mxu1 %v10079_v8  ;;  %v1069_v61 = vand.u32 4294901760, %v57_v41  ;;  %v11174_v43 = vand.u32 4294901760, %v10133_v25 }
  0xf8   :  { %8512 = vmatprep.subr.bf16.mxu0 %v9557_v4  ;;  %8371 = vmatprep.subr.bf16.mxu1 %v9557_v4  ;;  %v10139_v11 = vpack.c.bf16 %v1183_v57, %v1176_v42  ;;  %v1189_v10 = vsub.f32 %v10131_v23, %v11175_v47  ;;  %v11169_v22 = vand.u32 4294901760, %v10173_v20  ;;  %v11168_v5 = vand.u32 4294901760, %v10175_v50 }
  0xf9   :  { %v10085_v44 = vpack.c.bf16 %v1072_v26, %v1069_v61  ;;  %6936 = vmatprep.mubr.msk.f32.mxu0 %vm9558_vm0, %v9559_v14  ;;  %v1196_v13 = vsub.f32 %v10133_v25, %v11174_v43  ;;  %v10147_v17 = vsub.f32 %v57_v41, %v1069_v61  ;;  %v1210_v41 = vsub.f32 %v10149_v18, %v11172_v7 }
  0xfa   :  { %v1190_v46 = vand.u32 4294901760, %v1189_v10  ;;  %v11171_v61 = vand.u32 4294901760, %v10158_v2  ;;  %v11170_v26 = vand.u32 4294901760, %v10160_v21  ;;  %v1231_v57 = vsub.f32 %v10173_v20, %v11169_v22 }
  0xfb   :  { %8514 = vmatpush3.bf16.msra.mxu0 %v10079_v8  ;;  %8373 = vmatpush3.bf16.msra.mxu1 %v10085_v44  ;;  %v1197_v59 = vand.u32 4294901760, %v1196_v13  ;;  %v11173_v3 = vand.u32 4294901760, %v10147_v17  ;;  %v1211_v49 = vand.u32 4294901760, %v1210_v41  ;;  %v1238_v19 = vsub.f32 %v10175_v50, %v11168_v5 }
  0xfc   :  { %8515 = vmatprep.subr.bf16.mxu0 %v9557_v4  ;;  %8374 = vmatprep.subr.bf16.mxu1 %v9557_v4  ;;  %v1217_v40 = vsub.f32 %v10158_v2, %v11171_v61  ;;  %v1224_v45 = vsub.f32 %v10160_v21, %v11170_v26  ;;  %v1232_v0 = vand.u32 4294901760, %v1231_v57  ;;  %v10193_v10 = vpack.c.bf16 %v10109_v62, %v10107_v32 }
  0xfd   :  { %v10153_v35 = vpack.c.bf16 %v1197_v59, %v1190_v46  ;;  %v1203_v1 = vsub.f32 %v10147_v17, %v11173_v3  ;;  %v1239_v6 = vand.u32 4294901760, %v1238_v19  ;;  %v10197_v13 = vpack.c.bf16 %v10118_v31, %v10116_v58 }
  0xfe   :  { %v1218_v16 = vand.u32 4294901760, %v1217_v40  ;;  %v1225_v56 = vand.u32 4294901760, %v1224_v45  ;;  %v10201_v46 = vpack.c.bf16 %v10133_v25, %v10131_v23  ;;  %v10205_v59 = vpack.c.bf16 %v10149_v18, %v10147_v17 }
  0xff   :  { %8517 = vmatpush3.bf16.msra.mxu0 %v10085_v44  ;;  %8376 = vmatpush3.bf16.msra.mxu1 %v10091_v29  ;;  %v1204_v60 = vand.u32 4294901760, %v1203_v1  ;;  %v10189_v27 = vpack.c.bf16 %v1239_v6, %v1232_v0  ;;  %v10209_v1 = vpack.c.bf16 %v10160_v21, %v10158_v2  ;;  %v10213_v41 = vpack.c.bf16 %v10175_v50, %v10173_v20 }
 0x100   :  { %8518 = vmatprep.subr.bf16.mxu0 %v9557_v4  ;;  %8377 = vmatprep.subr.bf16.mxu1 %v9557_v4  ;;  %v10181_v42 = vpack.c.bf16 %v1225_v56, %v1218_v16  ;;  %v10225_v0 = vsub.f32 %v9939_v34, %v1039_v38  ;;  %v10232_v5 = vsub.f32 %v9941_v36, %v1042_v9  ;;  %v11216_v32 = vand.u32 4294901760, %v10131_v23 }
 0x101   :  { %v10177_v39 = vpack.c.bf16 %v1211_v49, %v1204_v60  ;;  %v5564_v60 = vld [vmem:[%s11134_s3] ss:$0 sm:$0xff]  ;;  %v10243_v34 = vsub.f32 %v9943_v37, %v1045_v15  ;;  %v10248_v36 = vsub.f32 %v9948_v53, %v1048_v55  ;;  %v11217_v62 = vand.u32 4294901760, %v10133_v25 }
 0x102   :  { %v1139_v26 = vand.u32 4294901760, %v10232_v5  ;;  %v11220_v23 = vand.u32 4294901760, %v10158_v2  ;;  %v11221_v25 = vand.u32 4294901760, %v10160_v21 }
 0x103   :  { %8520 = vmatpush3.bf16.msra.mxu0 %v10091_v29  ;;  %8379 = vmatpush3.bf16.msra.mxu1 %v10100_v28  ;;  %v1146_v15 = vand.u32 4294901760, %v10243_v34  ;;  %v1153_v53 = vand.u32 4294901760, %v10248_v36 }
 0x104   :  { %8521 = vmatprep.subr.bf16.mxu0 %v9557_v4  ;;  %8380 = vmatprep.subr.bf16.mxu1 %v9557_v4  ;;  %v1140_v37 = vsub.f32 %v10232_v5, %v1139_v26 }
 0x105   :  { %v1154_v3 = vsub.f32 %v10248_v36, %v1153_v53 }
 0x107   :  { %8523 = vmatpush3.bf16.msra.mxu0 %v10100_v28  ;;  %v1155_v52 = vand.u32 4294901760, %v1154_v3 }
 0x108   :  { %8524 = vmatprep.subr.bf16.mxu0 %v9557_v4 }
 0x1bd   :  { %v6684_v49 = vpop.f32.mrb[0].mxu0 }
 0x1be   :  { %v10218_v40 = vadd.f32 %v6684_v49, %v5564_v60  ;;  %v990_v45 = vpop.f32.mrb[1].mxu0 }
 0x1bf   :  { %v9365_v16 = vadd.f32 %v5564_v60, %v990_v45 }
 0x1c1   :  { %9489 = vtanh.f32 %v9365_v16  ;;  %v6687_v56 = vpop.f32.mrb[2].mxu0  ;;  %v1132_v16 = vand.u32 4294901760, %v10225_v0 }
 0x1c2   :  { %v10220_v57 = vadd.f32 %v6687_v56, %v5564_v60  ;;  %v1002_v19 = vpop.f32.mrb[3].mxu0 }
 0x1c3   :  { %v10227_v6 = vadd.f32 %v5564_v60, %v1002_v19  ;;  %v10351_v3 = vpack.c.bf16 %v1139_v26, %v1132_v16  ;;  %v11214_v26 = vand.u32 4294901760, %v10116_v58  ;;  %v11219_v58 = vand.u32 4294901760, %v10149_v18 }
 0x1c4   :  { %v11223_v18 = vand.u32 4294901760, %v10175_v50 }
 0x1c5   :  { %v6690_v49 = vpop.f32.mrb[4].mxu0 }
 0x1c6   :  { %v10234_v22 = vadd.f32 %v6690_v49, %v5564_v60  ;;  %v1014_v45 = vpop.f32.mrb[5].mxu0  ;;  %v1133_v49 = vsub.f32 %v10225_v0, %v1132_v16  ;;  %v10403_v16 = vpack.c.bf16 %v11221_v25, %v11220_v23 }
 0x1c7   :  { %v10237_v56 = vadd.f32 %v5564_v60, %v1014_v45 }
 0x1c8   :  { %v1134_v7 = vand.u32 4294901760, %v1133_v49 }
 0x1c9   :  { %v6693_v38 = vpop.f32.mrb[6].mxu0 }
 0x1ca   :  { %v10250_v9 = vadd.f32 %v6693_v38, %v5564_v60  ;;  %v1026_v19 = vpop.f32.mrb[7].mxu0 }
 0x1cb   :  { %v9490_v45 = vpop.eup %9489  ;;  %v10255_v61 = vadd.f32 %v5564_v60, %v1026_v19  ;;  %v1141_v60 = vand.u32 4294901760, %v1140_v37  ;;  %v1147_v19 = vsub.f32 %v10243_v34, %v1146_v15 }
 0x1cc   :  { %1037 = vst [vmem:[%s11135_s4] sm:$0xff] %v9490_v45  ;;  %v10265_v55 = vand.u32 4294901760, %v9490_v45 }
 0x1cd   :  { %v10280_v54 = vpack.c.bf16 %v1141_v60, %v1134_v7  ;;  %v10361_v7 = vpack.c.bf16 %v1153_v53, %v1146_v15 }
 0x1ce   :  { %v10268_v38 = vsub.f32 %v9490_v45, %v10265_v55  ;;  %v1148_v45 = vand.u32 4294901760, %v1147_v19 }
 0x1d0   :  { %v1121_v43 = vand.u32 4294901760, %v10268_v38  ;;  %v10283_v37 = vpack.c.bf16 %v1155_v52, %v1148_v45  ;;  %v10303_v52 = vpack.c.bf16 %v10232_v5, %v10225_v0  ;;  %v11215_v5 = vand.u32 4294901760, %v10118_v31 }
 0x1d2   :  { %v1122_v47 = vsub.f32 %v10268_v38, %v1121_v43  ;;  %v10379_v0 = vpack.c.bf16 %v11215_v5, %v11214_v26 }
 0x1d4   :  { %v1123_v49 = vand.u32 4294901760, %v1122_v47  ;;  %v10310_v47 = vpack.c.bf16 %v10248_v36, %v10243_v34 }
 0x1d6   :  { %6727 = vmatmul.mubr.f32.vlgmr.msra.gmra.mrb[0].mxu1 %v1123_v49 }
 0x1d7   :  { %8382 = vmatpush3.bf16.msra.mxu1 %v10280_v54  ;;  %6761 = vmatprep.mubr.msk.f32.mxu1 %vm9558_vm0, %v9559_v14 }
 0x1d8   :  { %8383 = vmatprep.subr.bf16.mxu1 %v9557_v4 }
 0x1db   :  { %8385 = vmatpush3.bf16.msra.mxu1 %v10283_v37 }
 0x1dc   :  { %8386 = vmatprep.subr.bf16.mxu1 %v9557_v4 }
 0x1df   :  { %8388 = vmatpush3.bf16.msra.mxu1 %v10135_v51 }
 0x1e0   :  { %8389 = vmatprep.subr.bf16.mxu1 %v9557_v4 }
 0x1e3   :  { %8391 = vmatpush3.bf16.msra.mxu1 %v10139_v11 }
 0x1e4   :  { %8392 = vmatprep.subr.bf16.mxu1 %v9557_v4 }
 0x1e7   :  { %8394 = vmatpush3.bf16.msra.mxu1 %v10153_v35 }
 0x1e8   :  { %8395 = vmatprep.subr.bf16.mxu1 %v9557_v4 }
 0x1eb   :  { %8397 = vmatpush3.bf16.msra.mxu1 %v10177_v39 }
 0x1ec   :  { %8398 = vmatprep.subr.bf16.mxu1 %v9557_v4 }
 0x1ef   :  { %8400 = vmatpush3.bf16.msra.mxu1 %v10181_v42 }
 0x1f0   :  { %8401 = vmatprep.subr.bf16.mxu1 %v9557_v4 }
 0x1f3   :  { %8403 = vmatpush3.bf16.msra.mxu1 %v10189_v27 }
 0x1f4   :  { %8404 = vmatprep.subr.bf16.mxu1 %v9557_v4 }
 0x1f6   :  { %6762 = vmatmul.mubr.f32.vlgmr.msra.gmra.mrb[0].mxu1 %v10265_v55 }
 0x1f7   :  { %8406 = vmatpush3.bf16.msra.mxu1 %v10303_v52  ;;  %6796 = vmatprep.mubr.msk.f32.mxu1 %vm9558_vm0, %v9559_v14 }
 0x1f8   :  { %8407 = vmatprep.subr.bf16.mxu1 %v9557_v4 }
 0x1fb   :  { %8409 = vmatpush3.bf16.msra.mxu1 %v10310_v47 }
 0x1fc   :  { %8410 = vmatprep.subr.bf16.mxu1 %v9557_v4 }
 0x1ff   :  { %8412 = vmatpush3.bf16.msra.mxu1 %v10193_v10 }
 0x200   :  { %8413 = vmatprep.subr.bf16.mxu1 %v9557_v4 }
 0x203   :  { %8415 = vmatpush3.bf16.msra.mxu1 %v10197_v13 }
 0x204   :  { %8416 = vmatprep.subr.bf16.mxu1 %v9557_v4 }
 0x207   :  { %8418 = vmatpush3.bf16.msra.mxu1 %v10201_v46 }
 0x208   :  { %8419 = vmatprep.subr.bf16.mxu1 %v9557_v4 }
 0x20b   :  { %8421 = vmatpush3.bf16.msra.mxu1 %v10205_v59 }
 0x20c   :  { %8422 = vmatprep.subr.bf16.mxu1 %v9557_v4 }
 0x20f   :  { %8424 = vmatpush3.bf16.msra.mxu1 %v10209_v1 }
 0x210   :  { %8425 = vmatprep.subr.bf16.mxu1 %v9557_v4 }
 0x213   :  { %8427 = vmatpush3.bf16.msra.mxu1 %v10213_v41 }
 0x214   :  { %8428 = vmatprep.subr.bf16.mxu1 %v9557_v4 }
 0x216   :  { %6797 = vmatmul.mubr.f32.vlgmr.msra.gmra.mrb[0].mxu1 %v10268_v38 }
 0x217   :  { %8430 = vmatpush3.bf16.msra.mxu1 %v9959_v63  ;;  %6831 = vmatprep.mubr.msk.f32.mxu1 %vm9558_vm0, %v9559_v14 }
 0x218   :  { %8431 = vmatprep.subr.bf16.mxu1 %v9557_v4 }
 0x21b   :  { %8433 = vmatpush3.bf16.msra.mxu1 %v9966_v12 }
 0x21c   :  { %8434 = vmatprep.subr.bf16.mxu1 %v9557_v4 }
 0x21f   :  { %8436 = vmatpush3.bf16.msra.mxu1 %v10067_v33 }
 0x220   :  { %8437 = vmatprep.subr.bf16.mxu1 %v9557_v4 }
 0x223   :  { %8439 = vmatpush3.bf16.msra.mxu1 %v10073_v24 }
 0x224   :  { %8440 = vmatprep.subr.bf16.mxu1 %v9557_v4 }
 0x227   :  { %8442 = vmatpush3.bf16.msra.mxu1 %v10079_v8 }
 0x228   :  { %8443 = vmatprep.subr.bf16.mxu1 %v9557_v4 }
 0x22b   :  { %8445 = vmatpush3.bf16.msra.mxu1 %v10085_v44 }
 0x22c   :  { %8446 = vmatprep.subr.bf16.mxu1 %v9557_v4 }
 0x22f   :  { %8448 = vmatpush3.bf16.msra.mxu1 %v10091_v29 }
 0x230   :  { %8449 = vmatprep.subr.bf16.mxu1 %v9557_v4 }
 0x233   :  { %8451 = vmatpush3.bf16.msra.mxu1 %v10100_v28 }
 0x234   :  { %8452 = vmatprep.subr.bf16.mxu1 %v9557_v4 }
 0x236   :  { %6832 = vmatmul.mubr.f32.vlgmr.msra.gmra.mrb[0].mxu1 %v1121_v43  ;;  %v10371_v43 = vpack.c.bf16 %v1167_v30, %v1160_v48  ;;  %v10387_v48 = vpack.c.bf16 %v11217_v62, %v11216_v32  ;;  %v11218_v30 = vand.u32 4294901760, %v10147_v17  ;;  %v11222_v17 = vand.u32 4294901760, %v10173_v20 }
 0x237   :  { %8454 = vmatpush3.bf16.msra.mxu1 %v10351_v3  ;;  %6866 = vmatprep.mubr.msk.f32.mxu1 %vm9558_vm0, %v9559_v14 }
 0x238   :  { %8455 = vmatprep.subr.bf16.mxu1 %v9557_v4  ;;  %v10395_v31 = vpack.c.bf16 %v11219_v58, %v11218_v30  ;;  %v10411_v34 = vpack.c.bf16 %v11223_v18, %v11222_v17 }
 0x23b   :  { %8457 = vmatpush3.bf16.msra.mxu1 %v10361_v7 }
 0x23c   :  { %8458 = vmatprep.subr.bf16.mxu1 %v9557_v4 }
 0x23f   :  { %8460 = vmatpush3.bf16.msra.mxu1 %v10371_v43 }
 0x240   :  { %8461 = vmatprep.subr.bf16.mxu1 %v9557_v4 }
 0x243   :  { %8463 = vmatpush3.bf16.msra.mxu1 %v10379_v0 }
 0x244   :  { %8464 = vmatprep.subr.bf16.mxu1 %v9557_v4 }
 0x247   :  { %8466 = vmatpush3.bf16.msra.mxu1 %v10387_v48 }
 0x248   :  { %8467 = vmatprep.subr.bf16.mxu1 %v9557_v4 }
 0x24b   :  { %8469 = vmatpush3.bf16.msra.mxu1 %v10395_v31 }
 0x24c   :  { %8470 = vmatprep.subr.bf16.mxu1 %v9557_v4 }
 0x24f   :  { %8472 = vmatpush3.bf16.msra.mxu1 %v10403_v16 }
 0x250   :  { %8473 = vmatprep.subr.bf16.mxu1 %v9557_v4 }
 0x253   :  { %8475 = vmatpush3.bf16.msra.mxu1 %v10411_v34 }
 0x254   :  { %8476 = vmatprep.subr.bf16.mxu1 %v9557_v4 }
 0x256   :  { %6867 = vmatmul.mubr.f32.vlgmr.msra.gmra.mrb[0].mxu1 %v10265_v55 }
 0x257   :  { %8478 = vmatpush3.bf16.msra.mxu1 %v9959_v63  ;;  %6901 = vmatprep.mubr.msk.f32.mxu1 %vm9558_vm0, %v9559_v14 }
 0x258   :  { %8479 = vmatprep.subr.bf16.mxu1 %v9557_v4 }
 0x25b   :  { %8481 = vmatpush3.bf16.msra.mxu1 %v9966_v12 }
 0x25c   :  { %8482 = vmatprep.subr.bf16.mxu1 %v9557_v4 }
 0x25f   :  { %8484 = vmatpush3.bf16.msra.mxu1 %v10067_v33 }
 0x260   :  { %8485 = vmatprep.subr.bf16.mxu1 %v9557_v4 }
 0x263   :  { %8487 = vmatpush3.bf16.msra.mxu1 %v10073_v24 }
 0x264   :  { %8488 = vmatprep.subr.bf16.mxu1 %v9557_v4 }
 0x267   :  { %8490 = vmatpush3.bf16.msra.mxu1 %v10079_v8 }
 0x268   :  { %8491 = vmatprep.subr.bf16.mxu1 %v9557_v4 }
 0x26b   :  { %8493 = vmatpush3.bf16.msra.mxu1 %v10085_v44 }
 0x26c   :  { %8494 = vmatprep.subr.bf16.mxu1 %v9557_v4 }
 0x26f   :  { %8496 = vmatpush3.bf16.msra.mxu1 %v10091_v29 }
 0x270   :  { %8497 = vmatprep.subr.bf16.mxu1 %v9557_v4 }
 0x273   :  { %8499 = vmatpush3.bf16.msra.mxu1 %v10100_v28 }
 0x274   :  { %8644 = vmatprep.subr.bf16.mxu1 %v9557_v4 }
 0x276   :  { %6902 = vmatmul.mubr.f32.vlgmr.msra.gmra.mrb[0].mxu1 %v10265_v55 }
 0x277   :  { %8646 = vmatpush3.bf16.msra.mxu1 %v9959_v63  ;;  %7146 = vmatprep.mubr.msk.f32.mxu1 %vm9558_vm0, %v9559_v14 }
 0x278   :  { %8647 = vmatprep.subr.bf16.mxu1 %v9557_v4 }
 0x27b   :  { %8649 = vmatpush3.bf16.msra.mxu1 %v9966_v12 }
 0x27c   :  { %8650 = vmatprep.subr.bf16.mxu1 %v9557_v4 }
 0x27f   :  { %8652 = vmatpush3.bf16.msra.mxu1 %v10067_v33 }
 0x280   :  { %8653 = vmatprep.subr.bf16.mxu1 %v9557_v4 }
 0x283   :  { %8655 = vmatpush3.bf16.msra.mxu1 %v10073_v24 }
 0x284   :  { %8656 = vmatprep.subr.bf16.mxu1 %v9557_v4 }
 0x287   :  { %8658 = vmatpush3.bf16.msra.mxu1 %v10079_v8 }
 0x288   :  { %8659 = vmatprep.subr.bf16.mxu1 %v9557_v4 }
 0x28b   :  { %8661 = vmatpush3.bf16.msra.mxu1 %v10085_v44 }
 0x28c   :  { %8662 = vmatprep.subr.bf16.mxu1 %v9557_v4 }
 0x28f   :  { %8664 = vmatpush3.bf16.msra.mxu1 %v10091_v29 }
 0x290   :  { %8665 = vmatprep.subr.bf16.mxu1 %v9557_v4 }
 0x293   :  { %8667 = vmatpush3.bf16.msra.mxu1 %v10100_v28 }
 0x294   :  { %8668 = vmatprep.subr.bf16.mxu1 %v9557_v4 }
 0x349   :  { %v1675_v2 = vpop.f32.mrb[0].mxu1 }
 0x34a   :  { %v1679_v21 = vadd.f32 %v10218_v40, %v1675_v2  ;;  %v6903_v20 = vpop.f32.mrb[1].mxu1 }
 0x34c   :  { %9491 = vtanh.f32 %v1679_v21 }
 0x356   :  { %v9492_v50 = vpop.eup %9491 }
 0x357   :  { %5565 = vst [vmem:[%s11135_s4 + $0x8] sm:$0xff] %v9492_v50  ;;  %v10458_v36 = vand.u32 4294901760, %v9492_v50 }
 0x359   :  { %v1765_v15 = vsub.f32 %v9492_v50, %v10458_v36 }
 0x35b   :  { %v1766_v53 = vand.u32 4294901760, %v1765_v15 }
 0x35d   :  { %v1767_v55 = vsub.f32 %v1765_v15, %v1766_v53 }
 0x35f   :  { %v1768_v38 = vand.u32 4294901760, %v1767_v55 }
 0x361   :  { %6937 = vmatmul.mubr.f32.vlgmr.msra.gmra.mrb[8].mxu0 %v1768_v38 }
 0x362   :  { %8526 = vmatpush3.bf16.msra.mxu0 %v10280_v54  ;;  %6971 = vmatprep.mubr.msk.f32.mxu0 %vm9558_vm0, %v9559_v14 }
 0x363   :  { %8527 = vmatprep.subr.bf16.mxu0 %v9557_v4 }
 0x366   :  { %8529 = vmatpush3.bf16.msra.mxu0 %v10283_v37 }
 0x367   :  { %8530 = vmatprep.subr.bf16.mxu0 %v9557_v4 }
 0x36a   :  { %8532 = vmatpush3.bf16.msra.mxu0 %v10135_v51 }
 0x36b   :  { %8533 = vmatprep.subr.bf16.mxu0 %v9557_v4 }
 0x36e   :  { %8535 = vmatpush3.bf16.msra.mxu0 %v10139_v11 }
 0x36f   :  { %8536 = vmatprep.subr.bf16.mxu0 %v9557_v4 }
 0x372   :  { %8538 = vmatpush3.bf16.msra.mxu0 %v10153_v35 }
 0x373   :  { %8539 = vmatprep.subr.bf16.mxu0 %v9557_v4 }
 0x376   :  { %8541 = vmatpush3.bf16.msra.mxu0 %v10177_v39 }
 0x377   :  { %8542 = vmatprep.subr.bf16.mxu0 %v9557_v4 }
 0x37a   :  { %8544 = vmatpush3.bf16.msra.mxu0 %v10181_v42 }
 0x37b   :  { %8545 = vmatprep.subr.bf16.mxu0 %v9557_v4 }
 0x37e   :  { %8547 = vmatpush3.bf16.msra.mxu0 %v10189_v27 }
 0x37f   :  { %8548 = vmatprep.subr.bf16.mxu0 %v9557_v4 }
 0x381   :  { %6972 = vmatmul.mubr.f32.vlgmr.msra.gmra.mrb[8].mxu0 %v10458_v36 }
 0x382   :  { %8550 = vmatpush3.bf16.msra.mxu0 %v10303_v52  ;;  %7006 = vmatprep.mubr.msk.f32.mxu0 %vm9558_vm0, %v9559_v14 }
 0x383   :  { %8551 = vmatprep.subr.bf16.mxu0 %v9557_v4 }
 0x386   :  { %8553 = vmatpush3.bf16.msra.mxu0 %v10310_v47 }
 0x387   :  { %8554 = vmatprep.subr.bf16.mxu0 %v9557_v4 }
 0x38a   :  { %8556 = vmatpush3.bf16.msra.mxu0 %v10193_v10 }
 0x38b   :  { %8557 = vmatprep.subr.bf16.mxu0 %v9557_v4 }
 0x38e   :  { %8559 = vmatpush3.bf16.msra.mxu0 %v10197_v13 }
 0x38f   :  { %8560 = vmatprep.subr.bf16.mxu0 %v9557_v4 }
 0x392   :  { %8562 = vmatpush3.bf16.msra.mxu0 %v10201_v46 }
 0x393   :  { %8563 = vmatprep.subr.bf16.mxu0 %v9557_v4 }
 0x396   :  { %8565 = vmatpush3.bf16.msra.mxu0 %v10205_v59 }
 0x397   :  { %8566 = vmatprep.subr.bf16.mxu0 %v9557_v4 }
 0x39a   :  { %8568 = vmatpush3.bf16.msra.mxu0 %v10209_v1 }
 0x39b   :  { %8569 = vmatprep.subr.bf16.mxu0 %v9557_v4 }
 0x39e   :  { %8571 = vmatpush3.bf16.msra.mxu0 %v10213_v41 }
 0x39f   :  { %8572 = vmatprep.subr.bf16.mxu0 %v9557_v4 }
 0x3a1   :  { %7007 = vmatmul.mubr.f32.vlgmr.msra.gmra.mrb[8].mxu0 %v1765_v15 }
 0x3a2   :  { %8574 = vmatpush3.bf16.msra.mxu0 %v9959_v63  ;;  %7041 = vmatprep.mubr.msk.f32.mxu0 %vm9558_vm0, %v9559_v14 }
 0x3a3   :  { %8575 = vmatprep.subr.bf16.mxu0 %v9557_v4 }
 0x3a6   :  { %8577 = vmatpush3.bf16.msra.mxu0 %v9966_v12 }
 0x3a7   :  { %8578 = vmatprep.subr.bf16.mxu0 %v9557_v4 }
 0x3aa   :  { %8580 = vmatpush3.bf16.msra.mxu0 %v10067_v33 }
 0x3ab   :  { %8581 = vmatprep.subr.bf16.mxu0 %v9557_v4 }
 0x3ae   :  { %8583 = vmatpush3.bf16.msra.mxu0 %v10073_v24 }
 0x3af   :  { %8584 = vmatprep.subr.bf16.mxu0 %v9557_v4 }
 0x3b2   :  { %8586 = vmatpush3.bf16.msra.mxu0 %v10079_v8 }
 0x3b3   :  { %8587 = vmatprep.subr.bf16.mxu0 %v9557_v4 }
 0x3b6   :  { %8589 = vmatpush3.bf16.msra.mxu0 %v10085_v44 }
 0x3b7   :  { %8590 = vmatprep.subr.bf16.mxu0 %v9557_v4 }
 0x3ba   :  { %8592 = vmatpush3.bf16.msra.mxu0 %v10091_v29 }
 0x3bb   :  { %8593 = vmatprep.subr.bf16.mxu0 %v9557_v4 }
 0x3be   :  { %8595 = vmatpush3.bf16.msra.mxu0 %v10100_v28 }
 0x3bf   :  { %8596 = vmatprep.subr.bf16.mxu0 %v9557_v4 }
 0x3c1   :  { %7042 = vmatmul.mubr.f32.vlgmr.msra.gmra.mrb[8].mxu0 %v1766_v53 }
 0x3c2   :  { %8598 = vmatpush3.bf16.msra.mxu0 %v10351_v3  ;;  %7076 = vmatprep.mubr.msk.f32.mxu0 %vm9558_vm0, %v9559_v14 }
 0x3c3   :  { %8599 = vmatprep.subr.bf16.mxu0 %v9557_v4 }
 0x3c6   :  { %8601 = vmatpush3.bf16.msra.mxu0 %v10361_v7 }
 0x3c7   :  { %8602 = vmatprep.subr.bf16.mxu0 %v9557_v4 }
 0x3ca   :  { %8604 = vmatpush3.bf16.msra.mxu0 %v10371_v43 }
 0x3cb   :  { %8605 = vmatprep.subr.bf16.mxu0 %v9557_v4 }
 0x3ce   :  { %8607 = vmatpush3.bf16.msra.mxu0 %v10379_v0 }
 0x3cf   :  { %8608 = vmatprep.subr.bf16.mxu0 %v9557_v4 }
 0x3d2   :  { %8610 = vmatpush3.bf16.msra.mxu0 %v10387_v48 }
 0x3d3   :  { %8611 = vmatprep.subr.bf16.mxu0 %v9557_v4 }
 0x3d6   :  { %8613 = vmatpush3.bf16.msra.mxu0 %v10395_v31 }
 0x3d7   :  { %8614 = vmatprep.subr.bf16.mxu0 %v9557_v4 }
 0x3da   :  { %8616 = vmatpush3.bf16.msra.mxu0 %v10403_v16 }
 0x3db   :  { %8617 = vmatprep.subr.bf16.mxu0 %v9557_v4 }
 0x3de   :  { %8619 = vmatpush3.bf16.msra.mxu0 %v10411_v34 }
 0x3df   :  { %8620 = vmatprep.subr.bf16.mxu0 %v9557_v4 }
 0x3e1   :  { %7077 = vmatmul.mubr.f32.vlgmr.msra.gmra.mrb[8].mxu0 %v10458_v36 }
 0x3e2   :  { %8622 = vmatpush3.bf16.msra.mxu0 %v9959_v63  ;;  %7111 = vmatprep.mubr.msk.f32.mxu0 %vm9558_vm0, %v9559_v14 }
 0x3e3   :  { %8623 = vmatprep.subr.bf16.mxu0 %v9557_v4 }
 0x3e6   :  { %8625 = vmatpush3.bf16.msra.mxu0 %v9966_v12 }
 0x3e7   :  { %8626 = vmatprep.subr.bf16.mxu0 %v9557_v4 }
 0x3ea   :  { %8628 = vmatpush3.bf16.msra.mxu0 %v10067_v33 }
 0x3eb   :  { %8629 = vmatprep.subr.bf16.mxu0 %v9557_v4 }
 0x3ee   :  { %8631 = vmatpush3.bf16.msra.mxu0 %v10073_v24 }
 0x3ef   :  { %8632 = vmatprep.subr.bf16.mxu0 %v9557_v4 }
 0x3f2   :  { %8634 = vmatpush3.bf16.msra.mxu0 %v10079_v8 }
 0x3f3   :  { %8635 = vmatprep.subr.bf16.mxu0 %v9557_v4 }
 0x3f6   :  { %8637 = vmatpush3.bf16.msra.mxu0 %v10085_v44 }
 0x3f7   :  { %8638 = vmatprep.subr.bf16.mxu0 %v9557_v4 }
 0x3fa   :  { %8640 = vmatpush3.bf16.msra.mxu0 %v10091_v29 }
 0x3fb   :  { %8641 = vmatprep.subr.bf16.mxu0 %v9557_v4 }
 0x3fe   :  { %8643 = vmatpush3.bf16.msra.mxu0 %v10100_v28 }
 0x3ff   :  { %8788 = vmatprep.subr.bf16.mxu0 %v9557_v4 }
 0x401   :  { %7112 = vmatmul.mubr.f32.vlgmr.msra.gmra.mrb[8].mxu0 %v10458_v36 }
 0x402   :  { %8790 = vmatpush3.bf16.msra.mxu0 %v9959_v63  ;;  %7356 = vmatprep.mubr.msk.f32.mxu0 %vm9558_vm0, %v9559_v14 }
 0x403   :  { %8791 = vmatprep.subr.bf16.mxu0 %v9557_v4 }
 0x406   :  { %8793 = vmatpush3.bf16.msra.mxu0 %v9966_v12 }
 0x407   :  { %8794 = vmatprep.subr.bf16.mxu0 %v9557_v4 }
 0x40a   :  { %8796 = vmatpush3.bf16.msra.mxu0 %v10067_v33 }
 0x40b   :  { %8797 = vmatprep.subr.bf16.mxu0 %v9557_v4 }
 0x40e   :  { %8799 = vmatpush3.bf16.msra.mxu0 %v10073_v24 }
 0x40f   :  { %8800 = vmatprep.subr.bf16.mxu0 %v9557_v4 }
 0x412   :  { %8802 = vmatpush3.bf16.msra.mxu0 %v10079_v8 }
 0x413   :  { %8803 = vmatprep.subr.bf16.mxu0 %v9557_v4 }
 0x416   :  { %8805 = vmatpush3.bf16.msra.mxu0 %v10085_v44 }
 0x417   :  { %8806 = vmatprep.subr.bf16.mxu0 %v9557_v4 }
 0x41a   :  { %8808 = vmatpush3.bf16.msra.mxu0 %v10091_v29 }
 0x41b   :  { %8809 = vmatprep.subr.bf16.mxu0 %v9557_v4 }
 0x41e   :  { %8811 = vmatpush3.bf16.msra.mxu0 %v10100_v28 }
 0x41f   :  { %8812 = vmatprep.subr.bf16.mxu0 %v9557_v4 }
 0x4d4   :  { %v2320_v40 = vpop.f32.mrb[8].mxu0 }
 0x4d5   :  { %v2324_v60 = vadd.f32 %v10227_v6, %v2320_v40  ;;  %v7113_v19 = vpop.f32.mrb[9].mxu0 }
 0x4d7   :  { %9493 = vtanh.f32 %v2324_v60 }
 0x4e1   :  { %v9494_v45 = vpop.eup %9493 }
 0x4e2   :  { %5566 = vst [vmem:[%s11135_s4 + $0x10] sm:$0xff] %v9494_v45  ;;  %v10576_v49 = vand.u32 4294901760, %v9494_v45 }
 0x4e4   :  { %v2410_v26 = vsub.f32 %v9494_v45, %v10576_v49 }
 0x4e6   :  { %v2411_v5 = vand.u32 4294901760, %v2410_v26 }
 0x4e8   :  { %v2412_v32 = vsub.f32 %v2410_v26, %v2411_v5 }
 0x4ea   :  { %v2413_v62 = vand.u32 4294901760, %v2412_v32 }
 0x4ec   :  { %7147 = vmatmul.mubr.f32.vlgmr.msra.gmra.mrb[2].mxu1 %v2413_v62 }
 0x4ed   :  { %8670 = vmatpush3.bf16.msra.mxu1 %v10280_v54  ;;  %7181 = vmatprep.mubr.msk.f32.mxu1 %vm9558_vm0, %v9559_v14 }
 0x4ee   :  { %8671 = vmatprep.subr.bf16.mxu1 %v9557_v4 }
 0x4f1   :  { %8673 = vmatpush3.bf16.msra.mxu1 %v10283_v37 }
 0x4f2   :  { %8674 = vmatprep.subr.bf16.mxu1 %v9557_v4 }
 0x4f5   :  { %8676 = vmatpush3.bf16.msra.mxu1 %v10135_v51 }
 0x4f6   :  { %8677 = vmatprep.subr.bf16.mxu1 %v9557_v4 }
 0x4f9   :  { %8679 = vmatpush3.bf16.msra.mxu1 %v10139_v11 }
 0x4fa   :  { %8680 = vmatprep.subr.bf16.mxu1 %v9557_v4 }
 0x4fd   :  { %8682 = vmatpush3.bf16.msra.mxu1 %v10153_v35 }
 0x4fe   :  { %8683 = vmatprep.subr.bf16.mxu1 %v9557_v4 }
 0x501   :  { %8685 = vmatpush3.bf16.msra.mxu1 %v10177_v39 }
 0x502   :  { %8686 = vmatprep.subr.bf16.mxu1 %v9557_v4 }
 0x505   :  { %8688 = vmatpush3.bf16.msra.mxu1 %v10181_v42 }
 0x506   :  { %8689 = vmatprep.subr.bf16.mxu1 %v9557_v4 }
 0x509   :  { %8691 = vmatpush3.bf16.msra.mxu1 %v10189_v27 }
 0x50a   :  { %8692 = vmatprep.subr.bf16.mxu1 %v9557_v4 }
 0x50c   :  { %7182 = vmatmul.mubr.f32.vlgmr.msra.gmra.mrb[2].mxu1 %v10576_v49 }
 0x50d   :  { %8694 = vmatpush3.bf16.msra.mxu1 %v10303_v52  ;;  %7216 = vmatprep.mubr.msk.f32.mxu1 %vm9558_vm0, %v9559_v14 }
 0x50e   :  { %8695 = vmatprep.subr.bf16.mxu1 %v9557_v4 }
 0x511   :  { %8697 = vmatpush3.bf16.msra.mxu1 %v10310_v47 }
 0x512   :  { %8698 = vmatprep.subr.bf16.mxu1 %v9557_v4 }
 0x515   :  { %8700 = vmatpush3.bf16.msra.mxu1 %v10193_v10 }
 0x516   :  { %8701 = vmatprep.subr.bf16.mxu1 %v9557_v4 }
 0x519   :  { %8703 = vmatpush3.bf16.msra.mxu1 %v10197_v13 }
 0x51a   :  { %8704 = vmatprep.subr.bf16.mxu1 %v9557_v4 }
 0x51d   :  { %8706 = vmatpush3.bf16.msra.mxu1 %v10201_v46 }
 0x51e   :  { %8707 = vmatprep.subr.bf16.mxu1 %v9557_v4 }
 0x521   :  { %8709 = vmatpush3.bf16.msra.mxu1 %v10205_v59 }
 0x522   :  { %8710 = vmatprep.subr.bf16.mxu1 %v9557_v4 }
 0x525   :  { %8712 = vmatpush3.bf16.msra.mxu1 %v10209_v1 }
 0x526   :  { %8713 = vmatprep.subr.bf16.mxu1 %v9557_v4 }
 0x529   :  { %8715 = vmatpush3.bf16.msra.mxu1 %v10213_v41 }
 0x52a   :  { %8716 = vmatprep.subr.bf16.mxu1 %v9557_v4 }
 0x52c   :  { %7217 = vmatmul.mubr.f32.vlgmr.msra.gmra.mrb[2].mxu1 %v2410_v26 }
 0x52d   :  { %8718 = vmatpush3.bf16.msra.mxu1 %v9959_v63  ;;  %7251 = vmatprep.mubr.msk.f32.mxu1 %vm9558_vm0, %v9559_v14 }
 0x52e   :  { %8719 = vmatprep.subr.bf16.mxu1 %v9557_v4 }
 0x531   :  { %8721 = vmatpush3.bf16.msra.mxu1 %v9966_v12 }
 0x532   :  { %8722 = vmatprep.subr.bf16.mxu1 %v9557_v4 }
 0x535   :  { %8724 = vmatpush3.bf16.msra.mxu1 %v10067_v33 }
 0x536   :  { %8725 = vmatprep.subr.bf16.mxu1 %v9557_v4 }
 0x539   :  { %8727 = vmatpush3.bf16.msra.mxu1 %v10073_v24 }
 0x53a   :  { %8728 = vmatprep.subr.bf16.mxu1 %v9557_v4 }
 0x53d   :  { %8730 = vmatpush3.bf16.msra.mxu1 %v10079_v8 }
 0x53e   :  { %8731 = vmatprep.subr.bf16.mxu1 %v9557_v4 }
 0x541   :  { %8733 = vmatpush3.bf16.msra.mxu1 %v10085_v44 }
 0x542   :  { %8734 = vmatprep.subr.bf16.mxu1 %v9557_v4 }
 0x545   :  { %8736 = vmatpush3.bf16.msra.mxu1 %v10091_v29 }
 0x546   :  { %8737 = vmatprep.subr.bf16.mxu1 %v9557_v4 }
 0x549   :  { %8739 = vmatpush3.bf16.msra.mxu1 %v10100_v28 }
 0x54a   :  { %8740 = vmatprep.subr.bf16.mxu1 %v9557_v4 }
 0x54c   :  { %7252 = vmatmul.mubr.f32.vlgmr.msra.gmra.mrb[2].mxu1 %v2411_v5 }
 0x54d   :  { %8742 = vmatpush3.bf16.msra.mxu1 %v10351_v3  ;;  %7286 = vmatprep.mubr.msk.f32.mxu1 %vm9558_vm0, %v9559_v14 }
 0x54e   :  { %8743 = vmatprep.subr.bf16.mxu1 %v9557_v4 }
 0x551   :  { %8745 = vmatpush3.bf16.msra.mxu1 %v10361_v7 }
 0x552   :  { %8746 = vmatprep.subr.bf16.mxu1 %v9557_v4 }
 0x555   :  { %8748 = vmatpush3.bf16.msra.mxu1 %v10371_v43 }
 0x556   :  { %8749 = vmatprep.subr.bf16.mxu1 %v9557_v4 }
 0x559   :  { %8751 = vmatpush3.bf16.msra.mxu1 %v10379_v0 }
 0x55a   :  { %8752 = vmatprep.subr.bf16.mxu1 %v9557_v4 }
 0x55d   :  { %8754 = vmatpush3.bf16.msra.mxu1 %v10387_v48 }
 0x55e   :  { %8755 = vmatprep.subr.bf16.mxu1 %v9557_v4 }
 0x561   :  { %8757 = vmatpush3.bf16.msra.mxu1 %v10395_v31 }
 0x562   :  { %8758 = vmatprep.subr.bf16.mxu1 %v9557_v4 }
 0x565   :  { %8760 = vmatpush3.bf16.msra.mxu1 %v10403_v16 }
 0x566   :  { %8761 = vmatprep.subr.bf16.mxu1 %v9557_v4 }
 0x569   :  { %8763 = vmatpush3.bf16.msra.mxu1 %v10411_v34 }
 0x56a   :  { %8764 = vmatprep.subr.bf16.mxu1 %v9557_v4 }
 0x56c   :  { %7287 = vmatmul.mubr.f32.vlgmr.msra.gmra.mrb[2].mxu1 %v10576_v49 }
 0x56d   :  { %8766 = vmatpush3.bf16.msra.mxu1 %v9959_v63  ;;  %7321 = vmatprep.mubr.msk.f32.mxu1 %vm9558_vm0, %v9559_v14 }
 0x56e   :  { %8767 = vmatprep.subr.bf16.mxu1 %v9557_v4 }
 0x571   :  { %8769 = vmatpush3.bf16.msra.mxu1 %v9966_v12 }
 0x572   :  { %8770 = vmatprep.subr.bf16.mxu1 %v9557_v4 }
 0x575   :  { %8772 = vmatpush3.bf16.msra.mxu1 %v10067_v33 }
 0x576   :  { %8773 = vmatprep.subr.bf16.mxu1 %v9557_v4 }
 0x579   :  { %8775 = vmatpush3.bf16.msra.mxu1 %v10073_v24 }
 0x57a   :  { %8776 = vmatprep.subr.bf16.mxu1 %v9557_v4 }
 0x57d   :  { %8778 = vmatpush3.bf16.msra.mxu1 %v10079_v8 }
 0x57e   :  { %8779 = vmatprep.subr.bf16.mxu1 %v9557_v4 }
 0x581   :  { %8781 = vmatpush3.bf16.msra.mxu1 %v10085_v44 }
 0x582   :  { %8782 = vmatprep.subr.bf16.mxu1 %v9557_v4 }
 0x585   :  { %8784 = vmatpush3.bf16.msra.mxu1 %v10091_v29 }
 0x586   :  { %8785 = vmatprep.subr.bf16.mxu1 %v9557_v4 }
 0x589   :  { %8787 = vmatpush3.bf16.msra.mxu1 %v10100_v28 }
 0x58a   :  { %8932 = vmatprep.subr.bf16.mxu1 %v9557_v4 }
 0x58c   :  { %7322 = vmatmul.mubr.f32.vlgmr.msra.gmra.mrb[2].mxu1 %v10576_v49 }
 0x58d   :  { %8934 = vmatpush3.bf16.msra.mxu1 %v9959_v63  ;;  %7566 = vmatprep.mubr.msk.f32.mxu1 %vm9558_vm0, %v9559_v14 }
 0x58e   :  { %8935 = vmatprep.subr.bf16.mxu1 %v9557_v4 }
 0x591   :  { %8937 = vmatpush3.bf16.msra.mxu1 %v9966_v12 }
 0x592   :  { %8938 = vmatprep.subr.bf16.mxu1 %v9557_v4 }
 0x595   :  { %8940 = vmatpush3.bf16.msra.mxu1 %v10067_v33 }
 0x596   :  { %8941 = vmatprep.subr.bf16.mxu1 %v9557_v4 }
 0x599   :  { %8943 = vmatpush3.bf16.msra.mxu1 %v10073_v24 }
 0x59a   :  { %8944 = vmatprep.subr.bf16.mxu1 %v9557_v4 }
 0x59d   :  { %8946 = vmatpush3.bf16.msra.mxu1 %v10079_v8 }
 0x59e   :  { %8947 = vmatprep.subr.bf16.mxu1 %v9557_v4 }
 0x5a1   :  { %8949 = vmatpush3.bf16.msra.mxu1 %v10085_v44 }
 0x5a2   :  { %8950 = vmatprep.subr.bf16.mxu1 %v9557_v4 }
 0x5a5   :  { %8952 = vmatpush3.bf16.msra.mxu1 %v10091_v29 }
 0x5a6   :  { %8953 = vmatprep.subr.bf16.mxu1 %v9557_v4 }
 0x5a9   :  { %8955 = vmatpush3.bf16.msra.mxu1 %v10100_v28 }
 0x5aa   :  { %8956 = vmatprep.subr.bf16.mxu1 %v9557_v4 }
 0x65f   :  { %v2965_v6 = vpop.f32.mrb[2].mxu1 }
 0x660   :  { %v2969_v30 = vadd.f32 %v10220_v57, %v2965_v6  ;;  %v7323_v58 = vpop.f32.mrb[3].mxu1 }
 0x662   :  { %9495 = vtanh.f32 %v2969_v30 }
 0x66c   :  { %v9496_v23 = vpop.eup %9495 }
 0x66d   :  { %5567 = vst [vmem:[%s11135_s4 + $0x18] sm:$0xff] %v9496_v23  ;;  %v10694_v25 = vand.u32 4294901760, %v9496_v23 }
 0x66f   :  { %v3055_v17 = vsub.f32 %v9496_v23, %v10694_v25 }
 0x671   :  { %v3056_v18 = vand.u32 4294901760, %v3055_v17 }
 0x673   :  { %v3057_v2 = vsub.f32 %v3055_v17, %v3056_v18 }
 0x675   :  { %v3058_v21 = vand.u32 4294901760, %v3057_v2 }
 0x677   :  { %7357 = vmatmul.mubr.f32.vlgmr.msra.gmra.mrb[10].mxu0 %v3058_v21 }
 0x678   :  { %8814 = vmatpush3.bf16.msra.mxu0 %v10280_v54  ;;  %7391 = vmatprep.mubr.msk.f32.mxu0 %vm9558_vm0, %v9559_v14 }
 0x679   :  { %8815 = vmatprep.subr.bf16.mxu0 %v9557_v4 }
 0x67c   :  { %8817 = vmatpush3.bf16.msra.mxu0 %v10283_v37 }
 0x67d   :  { %8818 = vmatprep.subr.bf16.mxu0 %v9557_v4 }
 0x680   :  { %8820 = vmatpush3.bf16.msra.mxu0 %v10135_v51 }
 0x681   :  { %8821 = vmatprep.subr.bf16.mxu0 %v9557_v4 }
 0x684   :  { %8823 = vmatpush3.bf16.msra.mxu0 %v10139_v11 }
 0x685   :  { %8824 = vmatprep.subr.bf16.mxu0 %v9557_v4 }
 0x688   :  { %8826 = vmatpush3.bf16.msra.mxu0 %v10153_v35 }
 0x689   :  { %8827 = vmatprep.subr.bf16.mxu0 %v9557_v4 }
 0x68c   :  { %8829 = vmatpush3.bf16.msra.mxu0 %v10177_v39 }
 0x68d   :  { %8830 = vmatprep.subr.bf16.mxu0 %v9557_v4 }
 0x690   :  { %8832 = vmatpush3.bf16.msra.mxu0 %v10181_v42 }
 0x691   :  { %8833 = vmatprep.subr.bf16.mxu0 %v9557_v4 }
 0x694   :  { %8835 = vmatpush3.bf16.msra.mxu0 %v10189_v27 }
 0x695   :  { %8836 = vmatprep.subr.bf16.mxu0 %v9557_v4 }
 0x697   :  { %7392 = vmatmul.mubr.f32.vlgmr.msra.gmra.mrb[10].mxu0 %v10694_v25 }
 0x698   :  { %8838 = vmatpush3.bf16.msra.mxu0 %v10303_v52  ;;  %7426 = vmatprep.mubr.msk.f32.mxu0 %vm9558_vm0, %v9559_v14 }
 0x699   :  { %8839 = vmatprep.subr.bf16.mxu0 %v9557_v4 }
 0x69c   :  { %8841 = vmatpush3.bf16.msra.mxu0 %v10310_v47 }
 0x69d   :  { %8842 = vmatprep.subr.bf16.mxu0 %v9557_v4 }
 0x6a0   :  { %8844 = vmatpush3.bf16.msra.mxu0 %v10193_v10 }
 0x6a1   :  { %8845 = vmatprep.subr.bf16.mxu0 %v9557_v4 }
 0x6a4   :  { %8847 = vmatpush3.bf16.msra.mxu0 %v10197_v13 }
 0x6a5   :  { %8848 = vmatprep.subr.bf16.mxu0 %v9557_v4 }
 0x6a8   :  { %8850 = vmatpush3.bf16.msra.mxu0 %v10201_v46 }
 0x6a9   :  { %8851 = vmatprep.subr.bf16.mxu0 %v9557_v4 }
 0x6ac   :  { %8853 = vmatpush3.bf16.msra.mxu0 %v10205_v59 }
 0x6ad   :  { %8854 = vmatprep.subr.bf16.mxu0 %v9557_v4 }
 0x6b0   :  { %8856 = vmatpush3.bf16.msra.mxu0 %v10209_v1 }
 0x6b1   :  { %8857 = vmatprep.subr.bf16.mxu0 %v9557_v4 }
 0x6b4   :  { %8859 = vmatpush3.bf16.msra.mxu0 %v10213_v41 }
 0x6b5   :  { %8860 = vmatprep.subr.bf16.mxu0 %v9557_v4 }
 0x6b7   :  { %7427 = vmatmul.mubr.f32.vlgmr.msra.gmra.mrb[10].mxu0 %v3055_v17 }
 0x6b8   :  { %8862 = vmatpush3.bf16.msra.mxu0 %v9959_v63  ;;  %7461 = vmatprep.mubr.msk.f32.mxu0 %vm9558_vm0, %v9559_v14 }
 0x6b9   :  { %8863 = vmatprep.subr.bf16.mxu0 %v9557_v4 }
 0x6bc   :  { %8865 = vmatpush3.bf16.msra.mxu0 %v9966_v12 }
 0x6bd   :  { %8866 = vmatprep.subr.bf16.mxu0 %v9557_v4 }
 0x6c0   :  { %8868 = vmatpush3.bf16.msra.mxu0 %v10067_v33 }
 0x6c1   :  { %8869 = vmatprep.subr.bf16.mxu0 %v9557_v4 }
 0x6c4   :  { %8871 = vmatpush3.bf16.msra.mxu0 %v10073_v24 }
 0x6c5   :  { %8872 = vmatprep.subr.bf16.mxu0 %v9557_v4 }
 0x6c8   :  { %8874 = vmatpush3.bf16.msra.mxu0 %v10079_v8 }
 0x6c9   :  { %8875 = vmatprep.subr.bf16.mxu0 %v9557_v4 }
 0x6cc   :  { %8877 = vmatpush3.bf16.msra.mxu0 %v10085_v44 }
 0x6cd   :  { %8878 = vmatprep.subr.bf16.mxu0 %v9557_v4 }
 0x6d0   :  { %8880 = vmatpush3.bf16.msra.mxu0 %v10091_v29 }
 0x6d1   :  { %8881 = vmatprep.subr.bf16.mxu0 %v9557_v4 }
 0x6d4   :  { %8883 = vmatpush3.bf16.msra.mxu0 %v10100_v28 }
 0x6d5   :  { %8884 = vmatprep.subr.bf16.mxu0 %v9557_v4 }
 0x6d7   :  { %7462 = vmatmul.mubr.f32.vlgmr.msra.gmra.mrb[10].mxu0 %v3056_v18 }
 0x6d8   :  { %8886 = vmatpush3.bf16.msra.mxu0 %v10351_v3  ;;  %7496 = vmatprep.mubr.msk.f32.mxu0 %vm9558_vm0, %v9559_v14 }
 0x6d9   :  { %8887 = vmatprep.subr.bf16.mxu0 %v9557_v4 }
 0x6dc   :  { %8889 = vmatpush3.bf16.msra.mxu0 %v10361_v7 }
 0x6dd   :  { %8890 = vmatprep.subr.bf16.mxu0 %v9557_v4 }
 0x6e0   :  { %8892 = vmatpush3.bf16.msra.mxu0 %v10371_v43 }
 0x6e1   :  { %8893 = vmatprep.subr.bf16.mxu0 %v9557_v4 }
 0x6e4   :  { %8895 = vmatpush3.bf16.msra.mxu0 %v10379_v0 }
 0x6e5   :  { %8896 = vmatprep.subr.bf16.mxu0 %v9557_v4 }
 0x6e8   :  { %8898 = vmatpush3.bf16.msra.mxu0 %v10387_v48 }
 0x6e9   :  { %8899 = vmatprep.subr.bf16.mxu0 %v9557_v4 }
 0x6ec   :  { %8901 = vmatpush3.bf16.msra.mxu0 %v10395_v31 }
 0x6ed   :  { %8902 = vmatprep.subr.bf16.mxu0 %v9557_v4 }
 0x6f0   :  { %8904 = vmatpush3.bf16.msra.mxu0 %v10403_v16 }
 0x6f1   :  { %8905 = vmatprep.subr.bf16.mxu0 %v9557_v4 }
 0x6f4   :  { %8907 = vmatpush3.bf16.msra.mxu0 %v10411_v34 }
 0x6f5   :  { %8908 = vmatprep.subr.bf16.mxu0 %v9557_v4 }
 0x6f7   :  { %7497 = vmatmul.mubr.f32.vlgmr.msra.gmra.mrb[10].mxu0 %v10694_v25 }
 0x6f8   :  { %8910 = vmatpush3.bf16.msra.mxu0 %v9959_v63  ;;  %7531 = vmatprep.mubr.msk.f32.mxu0 %vm9558_vm0, %v9559_v14 }
 0x6f9   :  { %8911 = vmatprep.subr.bf16.mxu0 %v9557_v4 }
 0x6fc   :  { %8913 = vmatpush3.bf16.msra.mxu0 %v9966_v12 }
 0x6fd   :  { %8914 = vmatprep.subr.bf16.mxu0 %v9557_v4 }
 0x700   :  { %8916 = vmatpush3.bf16.msra.mxu0 %v10067_v33 }
 0x701   :  { %8917 = vmatprep.subr.bf16.mxu0 %v9557_v4 }
 0x704   :  { %8919 = vmatpush3.bf16.msra.mxu0 %v10073_v24 }
 0x705   :  { %8920 = vmatprep.subr.bf16.mxu0 %v9557_v4 }
 0x708   :  { %8922 = vmatpush3.bf16.msra.mxu0 %v10079_v8 }
 0x709   :  { %8923 = vmatprep.subr.bf16.mxu0 %v9557_v4 }
 0x70c   :  { %8925 = vmatpush3.bf16.msra.mxu0 %v10085_v44 }
 0x70d   :  { %8926 = vmatprep.subr.bf16.mxu0 %v9557_v4 }
 0x710   :  { %8928 = vmatpush3.bf16.msra.mxu0 %v10091_v29 }
 0x711   :  { %8929 = vmatprep.subr.bf16.mxu0 %v9557_v4 }
 0x714   :  { %8931 = vmatpush3.bf16.msra.mxu0 %v10100_v28 }
 0x715   :  { %9076 = vmatprep.subr.bf16.mxu0 %v9557_v4 }
 0x717   :  { %7532 = vmatmul.mubr.f32.vlgmr.msra.gmra.mrb[10].mxu0 %v10694_v25 }
 0x718   :  { %9078 = vmatpush3.bf16.msra.mxu0 %v9959_v63  ;;  %7776 = vmatprep.mubr.msk.f32.mxu0 %vm9558_vm0, %v9559_v14 }
 0x719   :  { %9079 = vmatprep.subr.bf16.mxu0 %v9557_v4 }
 0x71c   :  { %9081 = vmatpush3.bf16.msra.mxu0 %v9966_v12 }
 0x71d   :  { %9082 = vmatprep.subr.bf16.mxu0 %v9557_v4 }
 0x720   :  { %9084 = vmatpush3.bf16.msra.mxu0 %v10067_v33 }
 0x721   :  { %9085 = vmatprep.subr.bf16.mxu0 %v9557_v4 }
 0x724   :  { %9087 = vmatpush3.bf16.msra.mxu0 %v10073_v24 }
 0x725   :  { %9088 = vmatprep.subr.bf16.mxu0 %v9557_v4 }
 0x728   :  { %9090 = vmatpush3.bf16.msra.mxu0 %v10079_v8 }
 0x729   :  { %9091 = vmatprep.subr.bf16.mxu0 %v9557_v4 }
 0x72c   :  { %9093 = vmatpush3.bf16.msra.mxu0 %v10085_v44 }
 0x72d   :  { %9094 = vmatprep.subr.bf16.mxu0 %v9557_v4 }
 0x730   :  { %9096 = vmatpush3.bf16.msra.mxu0 %v10091_v29 }
 0x731   :  { %9097 = vmatprep.subr.bf16.mxu0 %v9557_v4 }
 0x734   :  { %9099 = vmatpush3.bf16.msra.mxu0 %v10100_v28 }
 0x735   :  { %9100 = vmatprep.subr.bf16.mxu0 %v9557_v4 }
 0x7ea   :  { %v3610_v57 = vpop.f32.mrb[10].mxu0 }
 0x7eb   :  { %v3614_v20 = vadd.f32 %v10237_v56, %v3610_v57  ;;  %v7533_v50 = vpop.f32.mrb[11].mxu0 }
 0x7ed   :  { %9497 = vtanh.f32 %v3614_v20 }
 0x7f7   :  { %v9498_v36 = vpop.eup %9497 }
 0x7f8   :  { %5568 = vst [vmem:[%s11135_s4 + $0x20] sm:$0xff] %v9498_v36  ;;  %v10812_v15 = vand.u32 4294901760, %v9498_v36 }
 0x7fa   :  { %v3700_v53 = vsub.f32 %v9498_v36, %v10812_v15 }
 0x7fc   :  { %v3701_v55 = vand.u32 4294901760, %v3700_v53 }
 0x7fe   :  { %v3702_v38 = vsub.f32 %v3700_v53, %v3701_v55 }
 0x800   :  { %v3703_v40 = vand.u32 4294901760, %v3702_v38 }
 0x802   :  { %7567 = vmatmul.mubr.f32.vlgmr.msra.gmra.mrb[4].mxu1 %v3703_v40 }
 0x803   :  { %8958 = vmatpush3.bf16.msra.mxu1 %v10280_v54  ;;  %7601 = vmatprep.mubr.msk.f32.mxu1 %vm9558_vm0, %v9559_v14 }
 0x804   :  { %8959 = vmatprep.subr.bf16.mxu1 %v9557_v4 }
 0x807   :  { %8961 = vmatpush3.bf16.msra.mxu1 %v10283_v37 }
 0x808   :  { %8962 = vmatprep.subr.bf16.mxu1 %v9557_v4 }
 0x80b   :  { %8964 = vmatpush3.bf16.msra.mxu1 %v10135_v51 }
 0x80c   :  { %8965 = vmatprep.subr.bf16.mxu1 %v9557_v4 }
 0x80f   :  { %8967 = vmatpush3.bf16.msra.mxu1 %v10139_v11 }
 0x810   :  { %8968 = vmatprep.subr.bf16.mxu1 %v9557_v4 }
 0x813   :  { %8970 = vmatpush3.bf16.msra.mxu1 %v10153_v35 }
 0x814   :  { %8971 = vmatprep.subr.bf16.mxu1 %v9557_v4 }
 0x817   :  { %8973 = vmatpush3.bf16.msra.mxu1 %v10177_v39 }
 0x818   :  { %8974 = vmatprep.subr.bf16.mxu1 %v9557_v4 }
 0x81b   :  { %8976 = vmatpush3.bf16.msra.mxu1 %v10181_v42 }
 0x81c   :  { %8977 = vmatprep.subr.bf16.mxu1 %v9557_v4 }
 0x81f   :  { %8979 = vmatpush3.bf16.msra.mxu1 %v10189_v27 }
 0x820   :  { %8980 = vmatprep.subr.bf16.mxu1 %v9557_v4 }
 0x822   :  { %7602 = vmatmul.mubr.f32.vlgmr.msra.gmra.mrb[4].mxu1 %v10812_v15 }
 0x823   :  { %8982 = vmatpush3.bf16.msra.mxu1 %v10303_v52  ;;  %7636 = vmatprep.mubr.msk.f32.mxu1 %vm9558_vm0, %v9559_v14 }
 0x824   :  { %8983 = vmatprep.subr.bf16.mxu1 %v9557_v4 }
 0x827   :  { %8985 = vmatpush3.bf16.msra.mxu1 %v10310_v47 }
 0x828   :  { %8986 = vmatprep.subr.bf16.mxu1 %v9557_v4 }
 0x82b   :  { %8988 = vmatpush3.bf16.msra.mxu1 %v10193_v10 }
 0x82c   :  { %8989 = vmatprep.subr.bf16.mxu1 %v9557_v4 }
 0x82f   :  { %8991 = vmatpush3.bf16.msra.mxu1 %v10197_v13 }
 0x830   :  { %8992 = vmatprep.subr.bf16.mxu1 %v9557_v4 }
 0x833   :  { %8994 = vmatpush3.bf16.msra.mxu1 %v10201_v46 }
 0x834   :  { %8995 = vmatprep.subr.bf16.mxu1 %v9557_v4 }
 0x837   :  { %8997 = vmatpush3.bf16.msra.mxu1 %v10205_v59 }
 0x838   :  { %8998 = vmatprep.subr.bf16.mxu1 %v9557_v4 }
 0x83b   :  { %9000 = vmatpush3.bf16.msra.mxu1 %v10209_v1 }
 0x83c   :  { %9001 = vmatprep.subr.bf16.mxu1 %v9557_v4 }
 0x83f   :  { %9003 = vmatpush3.bf16.msra.mxu1 %v10213_v41 }
 0x840   :  { %9004 = vmatprep.subr.bf16.mxu1 %v9557_v4 }
 0x842   :  { %7637 = vmatmul.mubr.f32.vlgmr.msra.gmra.mrb[4].mxu1 %v3700_v53 }
 0x843   :  { %9006 = vmatpush3.bf16.msra.mxu1 %v9959_v63  ;;  %7671 = vmatprep.mubr.msk.f32.mxu1 %vm9558_vm0, %v9559_v14 }
 0x844   :  { %9007 = vmatprep.subr.bf16.mxu1 %v9557_v4 }
 0x847   :  { %9009 = vmatpush3.bf16.msra.mxu1 %v9966_v12 }
 0x848   :  { %9010 = vmatprep.subr.bf16.mxu1 %v9557_v4 }
 0x84b   :  { %9012 = vmatpush3.bf16.msra.mxu1 %v10067_v33 }
 0x84c   :  { %9013 = vmatprep.subr.bf16.mxu1 %v9557_v4 }
 0x84f   :  { %9015 = vmatpush3.bf16.msra.mxu1 %v10073_v24 }
 0x850   :  { %9016 = vmatprep.subr.bf16.mxu1 %v9557_v4 }
 0x853   :  { %9018 = vmatpush3.bf16.msra.mxu1 %v10079_v8 }
 0x854   :  { %9019 = vmatprep.subr.bf16.mxu1 %v9557_v4 }
 0x857   :  { %9021 = vmatpush3.bf16.msra.mxu1 %v10085_v44 }
 0x858   :  { %9022 = vmatprep.subr.bf16.mxu1 %v9557_v4 }
 0x85b   :  { %9024 = vmatpush3.bf16.msra.mxu1 %v10091_v29 }
 0x85c   :  { %9025 = vmatprep.subr.bf16.mxu1 %v9557_v4 }
 0x85f   :  { %9027 = vmatpush3.bf16.msra.mxu1 %v10100_v28 }
 0x860   :  { %9028 = vmatprep.subr.bf16.mxu1 %v9557_v4 }
 0x862   :  { %7672 = vmatmul.mubr.f32.vlgmr.msra.gmra.mrb[4].mxu1 %v3701_v55 }
 0x863   :  { %9030 = vmatpush3.bf16.msra.mxu1 %v10351_v3  ;;  %7706 = vmatprep.mubr.msk.f32.mxu1 %vm9558_vm0, %v9559_v14 }
 0x864   :  { %9031 = vmatprep.subr.bf16.mxu1 %v9557_v4 }
 0x867   :  { %9033 = vmatpush3.bf16.msra.mxu1 %v10361_v7 }
 0x868   :  { %9034 = vmatprep.subr.bf16.mxu1 %v9557_v4 }
 0x86b   :  { %9036 = vmatpush3.bf16.msra.mxu1 %v10371_v43 }
 0x86c   :  { %9037 = vmatprep.subr.bf16.mxu1 %v9557_v4 }
 0x86f   :  { %9039 = vmatpush3.bf16.msra.mxu1 %v10379_v0 }
 0x870   :  { %9040 = vmatprep.subr.bf16.mxu1 %v9557_v4 }
 0x873   :  { %9042 = vmatpush3.bf16.msra.mxu1 %v10387_v48 }
 0x874   :  { %9043 = vmatprep.subr.bf16.mxu1 %v9557_v4 }
 0x877   :  { %9045 = vmatpush3.bf16.msra.mxu1 %v10395_v31 }
 0x878   :  { %9046 = vmatprep.subr.bf16.mxu1 %v9557_v4 }
 0x87b   :  { %9048 = vmatpush3.bf16.msra.mxu1 %v10403_v16 }
 0x87c   :  { %9049 = vmatprep.subr.bf16.mxu1 %v9557_v4 }
 0x87f   :  { %9051 = vmatpush3.bf16.msra.mxu1 %v10411_v34 }
 0x880   :  { %9052 = vmatprep.subr.bf16.mxu1 %v9557_v4 }
 0x882   :  { %7707 = vmatmul.mubr.f32.vlgmr.msra.gmra.mrb[4].mxu1 %v10812_v15 }
 0x883   :  { %9054 = vmatpush3.bf16.msra.mxu1 %v9959_v63  ;;  %7741 = vmatprep.mubr.msk.f32.mxu1 %vm9558_vm0, %v9559_v14 }
 0x884   :  { %9055 = vmatprep.subr.bf16.mxu1 %v9557_v4 }
 0x887   :  { %9057 = vmatpush3.bf16.msra.mxu1 %v9966_v12 }
 0x888   :  { %9058 = vmatprep.subr.bf16.mxu1 %v9557_v4 }
 0x88b   :  { %9060 = vmatpush3.bf16.msra.mxu1 %v10067_v33 }
 0x88c   :  { %9061 = vmatprep.subr.bf16.mxu1 %v9557_v4 }
 0x88f   :  { %9063 = vmatpush3.bf16.msra.mxu1 %v10073_v24 }
 0x890   :  { %9064 = vmatprep.subr.bf16.mxu1 %v9557_v4 }
 0x893   :  { %9066 = vmatpush3.bf16.msra.mxu1 %v10079_v8 }
 0x894   :  { %9067 = vmatprep.subr.bf16.mxu1 %v9557_v4 }
 0x897   :  { %9069 = vmatpush3.bf16.msra.mxu1 %v10085_v44 }
 0x898   :  { %9070 = vmatprep.subr.bf16.mxu1 %v9557_v4 }
 0x89b   :  { %9072 = vmatpush3.bf16.msra.mxu1 %v10091_v29 }
 0x89c   :  { %9073 = vmatprep.subr.bf16.mxu1 %v9557_v4 }
 0x89f   :  { %9075 = vmatpush3.bf16.msra.mxu1 %v10100_v28 }
 0x8a0   :  { %9220 = vmatprep.subr.bf16.mxu1 %v9557_v4 }
 0x8a2   :  { %7742 = vmatmul.mubr.f32.vlgmr.msra.gmra.mrb[4].mxu1 %v10812_v15 }
 0x8a3   :  { %9222 = vmatpush3.bf16.msra.mxu1 %v9959_v63  ;;  %7986 = vmatprep.mubr.msk.f32.mxu1 %vm9558_vm0, %v9559_v14 }
 0x8a4   :  { %9223 = vmatprep.subr.bf16.mxu1 %v9557_v4 }
 0x8a7   :  { %9225 = vmatpush3.bf16.msra.mxu1 %v9966_v12 }
 0x8a8   :  { %9226 = vmatprep.subr.bf16.mxu1 %v9557_v4 }
 0x8ab   :  { %9228 = vmatpush3.bf16.msra.mxu1 %v10067_v33 }
 0x8ac   :  { %9229 = vmatprep.subr.bf16.mxu1 %v9557_v4 }
 0x8af   :  { %9231 = vmatpush3.bf16.msra.mxu1 %v10073_v24 }
 0x8b0   :  { %9232 = vmatprep.subr.bf16.mxu1 %v9557_v4 }
 0x8b3   :  { %9234 = vmatpush3.bf16.msra.mxu1 %v10079_v8 }
 0x8b4   :  { %9235 = vmatprep.subr.bf16.mxu1 %v9557_v4 }
 0x8b7   :  { %9237 = vmatpush3.bf16.msra.mxu1 %v10085_v44 }
 0x8b8   :  { %9238 = vmatprep.subr.bf16.mxu1 %v9557_v4 }
 0x8bb   :  { %9240 = vmatpush3.bf16.msra.mxu1 %v10091_v29 }
 0x8bc   :  { %9241 = vmatprep.subr.bf16.mxu1 %v9557_v4 }
 0x8bf   :  { %9243 = vmatpush3.bf16.msra.mxu1 %v10100_v28 }
 0x8c0   :  { %9244 = vmatprep.subr.bf16.mxu1 %v9557_v4 }
 0x975   :  { %v4255_v56 = vpop.f32.mrb[4].mxu1 }
 0x976   :  { %v4259_v60 = vadd.f32 %v10234_v22, %v4255_v56  ;;  %v7743_v19 = vpop.f32.mrb[5].mxu1 }
 0x978   :  { %9499 = vtanh.f32 %v4259_v60 }
 0x982   :  { %v9500_v45 = vpop.eup %9499 }
 0x983   :  { %5569 = vst [vmem:[%s11135_s4 + $0x28] sm:$0xff] %v9500_v45  ;;  %v10930_v49 = vand.u32 4294901760, %v9500_v45 }
 0x985   :  { %v4345_v26 = vsub.f32 %v9500_v45, %v10930_v49 }
 0x987   :  { %v4346_v5 = vand.u32 4294901760, %v4345_v26 }
 0x989   :  { %v4347_v32 = vsub.f32 %v4345_v26, %v4346_v5 }
 0x98b   :  { %v4348_v62 = vand.u32 4294901760, %v4347_v32 }
 0x98d   :  { %7777 = vmatmul.mubr.f32.vlgmr.msra.gmra.mrb[12].mxu0 %v4348_v62 }
 0x98e   :  { %9102 = vmatpush3.bf16.msra.mxu0 %v10280_v54  ;;  %7811 = vmatprep.mubr.msk.f32.mxu0 %vm9558_vm0, %v9559_v14 }
 0x98f   :  { %9103 = vmatprep.subr.bf16.mxu0 %v9557_v4 }
 0x992   :  { %9105 = vmatpush3.bf16.msra.mxu0 %v10283_v37 }
 0x993   :  { %9106 = vmatprep.subr.bf16.mxu0 %v9557_v4 }
 0x996   :  { %9108 = vmatpush3.bf16.msra.mxu0 %v10135_v51 }
 0x997   :  { %9109 = vmatprep.subr.bf16.mxu0 %v9557_v4 }
 0x99a   :  { %9111 = vmatpush3.bf16.msra.mxu0 %v10139_v11 }
 0x99b   :  { %9112 = vmatprep.subr.bf16.mxu0 %v9557_v4 }
 0x99e   :  { %9114 = vmatpush3.bf16.msra.mxu0 %v10153_v35 }
 0x99f   :  { %9115 = vmatprep.subr.bf16.mxu0 %v9557_v4 }
 0x9a2   :  { %9117 = vmatpush3.bf16.msra.mxu0 %v10177_v39 }
 0x9a3   :  { %9118 = vmatprep.subr.bf16.mxu0 %v9557_v4 }
 0x9a6   :  { %9120 = vmatpush3.bf16.msra.mxu0 %v10181_v42 }
 0x9a7   :  { %9121 = vmatprep.subr.bf16.mxu0 %v9557_v4 }
 0x9aa   :  { %9123 = vmatpush3.bf16.msra.mxu0 %v10189_v27 }
 0x9ab   :  { %9124 = vmatprep.subr.bf16.mxu0 %v9557_v4 }
 0x9ad   :  { %7812 = vmatmul.mubr.f32.vlgmr.msra.gmra.mrb[12].mxu0 %v10930_v49 }
 0x9ae   :  { %9126 = vmatpush3.bf16.msra.mxu0 %v10303_v52  ;;  %7846 = vmatprep.mubr.msk.f32.mxu0 %vm9558_vm0, %v9559_v14 }
 0x9af   :  { %9127 = vmatprep.subr.bf16.mxu0 %v9557_v4 }
 0x9b2   :  { %9129 = vmatpush3.bf16.msra.mxu0 %v10310_v47 }
 0x9b3   :  { %9130 = vmatprep.subr.bf16.mxu0 %v9557_v4 }
 0x9b6   :  { %9132 = vmatpush3.bf16.msra.mxu0 %v10193_v10 }
 0x9b7   :  { %9133 = vmatprep.subr.bf16.mxu0 %v9557_v4 }
 0x9ba   :  { %9135 = vmatpush3.bf16.msra.mxu0 %v10197_v13 }
 0x9bb   :  { %9136 = vmatprep.subr.bf16.mxu0 %v9557_v4 }
 0x9be   :  { %9138 = vmatpush3.bf16.msra.mxu0 %v10201_v46 }
 0x9bf   :  { %9139 = vmatprep.subr.bf16.mxu0 %v9557_v4 }
 0x9c2   :  { %9141 = vmatpush3.bf16.msra.mxu0 %v10205_v59 }
 0x9c3   :  { %9142 = vmatprep.subr.bf16.mxu0 %v9557_v4 }
 0x9c6   :  { %9144 = vmatpush3.bf16.msra.mxu0 %v10209_v1 }
 0x9c7   :  { %9145 = vmatprep.subr.bf16.mxu0 %v9557_v4 }
 0x9ca   :  { %9147 = vmatpush3.bf16.msra.mxu0 %v10213_v41 }
 0x9cb   :  { %9148 = vmatprep.subr.bf16.mxu0 %v9557_v4 }
 0x9cd   :  { %7847 = vmatmul.mubr.f32.vlgmr.msra.gmra.mrb[12].mxu0 %v4345_v26 }
 0x9ce   :  { %9150 = vmatpush3.bf16.msra.mxu0 %v9959_v63  ;;  %7881 = vmatprep.mubr.msk.f32.mxu0 %vm9558_vm0, %v9559_v14 }
 0x9cf   :  { %9151 = vmatprep.subr.bf16.mxu0 %v9557_v4 }
 0x9d2   :  { %9153 = vmatpush3.bf16.msra.mxu0 %v9966_v12 }
 0x9d3   :  { %9154 = vmatprep.subr.bf16.mxu0 %v9557_v4 }
 0x9d6   :  { %9156 = vmatpush3.bf16.msra.mxu0 %v10067_v33 }
 0x9d7   :  { %9157 = vmatprep.subr.bf16.mxu0 %v9557_v4 }
 0x9da   :  { %9159 = vmatpush3.bf16.msra.mxu0 %v10073_v24 }
 0x9db   :  { %9160 = vmatprep.subr.bf16.mxu0 %v9557_v4 }
 0x9de   :  { %9162 = vmatpush3.bf16.msra.mxu0 %v10079_v8 }
 0x9df   :  { %9163 = vmatprep.subr.bf16.mxu0 %v9557_v4 }
 0x9e2   :  { %9165 = vmatpush3.bf16.msra.mxu0 %v10085_v44 }
 0x9e3   :  { %9166 = vmatprep.subr.bf16.mxu0 %v9557_v4 }
 0x9e6   :  { %9168 = vmatpush3.bf16.msra.mxu0 %v10091_v29 }
 0x9e7   :  { %9169 = vmatprep.subr.bf16.mxu0 %v9557_v4 }
 0x9ea   :  { %9171 = vmatpush3.bf16.msra.mxu0 %v10100_v28 }
 0x9eb   :  { %9172 = vmatprep.subr.bf16.mxu0 %v9557_v4 }
 0x9ed   :  { %7882 = vmatmul.mubr.f32.vlgmr.msra.gmra.mrb[12].mxu0 %v4346_v5 }
 0x9ee   :  { %9174 = vmatpush3.bf16.msra.mxu0 %v10351_v3  ;;  %7916 = vmatprep.mubr.msk.f32.mxu0 %vm9558_vm0, %v9559_v14 }
 0x9ef   :  { %9175 = vmatprep.subr.bf16.mxu0 %v9557_v4 }
 0x9f2   :  { %9177 = vmatpush3.bf16.msra.mxu0 %v10361_v7 }
 0x9f3   :  { %9178 = vmatprep.subr.bf16.mxu0 %v9557_v4 }
 0x9f6   :  { %9180 = vmatpush3.bf16.msra.mxu0 %v10371_v43 }
 0x9f7   :  { %9181 = vmatprep.subr.bf16.mxu0 %v9557_v4 }
 0x9fa   :  { %9183 = vmatpush3.bf16.msra.mxu0 %v10379_v0 }
 0x9fb   :  { %9184 = vmatprep.subr.bf16.mxu0 %v9557_v4 }
 0x9fe   :  { %9186 = vmatpush3.bf16.msra.mxu0 %v10387_v48 }
 0x9ff   :  { %9187 = vmatprep.subr.bf16.mxu0 %v9557_v4 }
 0xa02   :  { %9189 = vmatpush3.bf16.msra.mxu0 %v10395_v31 }
 0xa03   :  { %9190 = vmatprep.subr.bf16.mxu0 %v9557_v4 }
 0xa06   :  { %9192 = vmatpush3.bf16.msra.mxu0 %v10403_v16 }
 0xa07   :  { %9193 = vmatprep.subr.bf16.mxu0 %v9557_v4 }
 0xa0a   :  { %9195 = vmatpush3.bf16.msra.mxu0 %v10411_v34 }
 0xa0b   :  { %9196 = vmatprep.subr.bf16.mxu0 %v9557_v4 }
 0xa0d   :  { %7917 = vmatmul.mubr.f32.vlgmr.msra.gmra.mrb[12].mxu0 %v10930_v49 }
 0xa0e   :  { %9198 = vmatpush3.bf16.msra.mxu0 %v9959_v63  ;;  %7951 = vmatprep.mubr.msk.f32.mxu0 %vm9558_vm0, %v9559_v14 }
 0xa0f   :  { %9199 = vmatprep.subr.bf16.mxu0 %v9557_v4 }
 0xa12   :  { %9201 = vmatpush3.bf16.msra.mxu0 %v9966_v12 }
 0xa13   :  { %9202 = vmatprep.subr.bf16.mxu0 %v9557_v4 }
 0xa16   :  { %9204 = vmatpush3.bf16.msra.mxu0 %v10067_v33 }
 0xa17   :  { %9205 = vmatprep.subr.bf16.mxu0 %v9557_v4 }
 0xa1a   :  { %9207 = vmatpush3.bf16.msra.mxu0 %v10073_v24 }
 0xa1b   :  { %9208 = vmatprep.subr.bf16.mxu0 %v9557_v4 }
 0xa1e   :  { %9210 = vmatpush3.bf16.msra.mxu0 %v10079_v8 }
 0xa1f   :  { %9211 = vmatprep.subr.bf16.mxu0 %v9557_v4 }
 0xa22   :  { %9213 = vmatpush3.bf16.msra.mxu0 %v10085_v44 }
 0xa23   :  { %9214 = vmatprep.subr.bf16.mxu0 %v9557_v4 }
 0xa26   :  { %9216 = vmatpush3.bf16.msra.mxu0 %v10091_v29 }
 0xa27   :  { %9217 = vmatprep.subr.bf16.mxu0 %v9557_v4 }
 0xa2a   :  { %9219 = vmatpush3.bf16.msra.mxu0 %v10100_v28 }
 0xa2d   :  { %7952 = vmatmul.mubr.f32.vlgmr.msra.gmra.mrb[12].mxu0 %v10930_v49 }
 0xb00   :  { %v4900_v22 = vpop.f32.mrb[12].mxu0 }
 0xb01   :  { %v4904_v6 = vadd.f32 %v10255_v61, %v4900_v22  ;;  %v7953_v30 = vpop.f32.mrb[13].mxu0 }
 0xb03   :  { %9501 = vtanh.f32 %v4904_v6 }
 0xb0d   :  { %v9502_v58 = vpop.eup %9501 }
 0xb0e   :  { %5570 = vst [vmem:[%s11135_s4 + $0x30] sm:$0xff] %v9502_v58  ;;  %v11029_v23 = vand.u32 4294901760, %v9502_v58 }
 0xb10   :  { %v4990_v25 = vsub.f32 %v9502_v58, %v11029_v23 }
 0xb12   :  { %v4991_v17 = vand.u32 4294901760, %v4990_v25 }
 0xb14   :  { %v4992_v18 = vsub.f32 %v4990_v25, %v4991_v17 }
 0xb16   :  { %v4993_v2 = vand.u32 4294901760, %v4992_v18 }
 0xb18   :  { %7987 = vmatmul.mubr.f32.vlgmr.msra.gmra.mrb[6].mxu1 %v4993_v2 }
 0xb19   :  { %9246 = vmatpush3.bf16.msra.mxu1 %v10280_v54  ;;  %8021 = vmatprep.mubr.msk.f32.mxu1 %vm9558_vm0, %v9559_v14 }
 0xb1a   :  { %9247 = vmatprep.subr.bf16.mxu1 %v9557_v4 }
 0xb1d   :  { %9249 = vmatpush3.bf16.msra.mxu1 %v10283_v37 }
 0xb1e   :  { %9250 = vmatprep.subr.bf16.mxu1 %v9557_v4 }
 0xb21   :  { %9252 = vmatpush3.bf16.msra.mxu1 %v10135_v51 }
 0xb22   :  { %9253 = vmatprep.subr.bf16.mxu1 %v9557_v4 }
 0xb25   :  { %9255 = vmatpush3.bf16.msra.mxu1 %v10139_v11 }
 0xb26   :  { %9256 = vmatprep.subr.bf16.mxu1 %v9557_v4 }
 0xb29   :  { %9258 = vmatpush3.bf16.msra.mxu1 %v10153_v35 }
 0xb2a   :  { %9259 = vmatprep.subr.bf16.mxu1 %v9557_v4 }
 0xb2d   :  { %9261 = vmatpush3.bf16.msra.mxu1 %v10177_v39 }
 0xb2e   :  { %9262 = vmatprep.subr.bf16.mxu1 %v9557_v4 }
 0xb31   :  { %9264 = vmatpush3.bf16.msra.mxu1 %v10181_v42 }
 0xb32   :  { %9265 = vmatprep.subr.bf16.mxu1 %v9557_v4 }
 0xb35   :  { %9267 = vmatpush3.bf16.msra.mxu1 %v10189_v27 }
 0xb36   :  { %9268 = vmatprep.subr.bf16.mxu1 %v9557_v4 }
 0xb38   :  { %8022 = vmatmul.mubr.f32.vlgmr.msra.gmra.mrb[6].mxu1 %v11029_v23 }
 0xb39   :  { %9270 = vmatpush3.bf16.msra.mxu1 %v10303_v52  ;;  %8056 = vmatprep.mubr.msk.f32.mxu1 %vm9558_vm0, %v9559_v14 }
 0xb3a   :  { %9271 = vmatprep.subr.bf16.mxu1 %v9557_v4 }
 0xb3d   :  { %9273 = vmatpush3.bf16.msra.mxu1 %v10310_v47 }
 0xb3e   :  { %9274 = vmatprep.subr.bf16.mxu1 %v9557_v4 }
 0xb41   :  { %9276 = vmatpush3.bf16.msra.mxu1 %v10193_v10 }
 0xb42   :  { %9277 = vmatprep.subr.bf16.mxu1 %v9557_v4 }
 0xb45   :  { %9279 = vmatpush3.bf16.msra.mxu1 %v10197_v13 }
 0xb46   :  { %9280 = vmatprep.subr.bf16.mxu1 %v9557_v4 }
 0xb49   :  { %9282 = vmatpush3.bf16.msra.mxu1 %v10201_v46 }
 0xb4a   :  { %9283 = vmatprep.subr.bf16.mxu1 %v9557_v4 }
 0xb4d   :  { %9285 = vmatpush3.bf16.msra.mxu1 %v10205_v59 }
 0xb4e   :  { %9286 = vmatprep.subr.bf16.mxu1 %v9557_v4 }
 0xb51   :  { %9288 = vmatpush3.bf16.msra.mxu1 %v10209_v1 }
 0xb52   :  { %9289 = vmatprep.subr.bf16.mxu1 %v9557_v4 }
 0xb55   :  { %9291 = vmatpush3.bf16.msra.mxu1 %v10213_v41 }
 0xb56   :  { %9292 = vmatprep.subr.bf16.mxu1 %v9557_v4 }
 0xb58   :  { %8057 = vmatmul.mubr.f32.vlgmr.msra.gmra.mrb[6].mxu1 %v4990_v25 }
 0xb59   :  { %9294 = vmatpush3.bf16.msra.mxu1 %v9959_v63  ;;  %8091 = vmatprep.mubr.msk.f32.mxu1 %vm9558_vm0, %v9559_v14 }
 0xb5a   :  { %9295 = vmatprep.subr.bf16.mxu1 %v9557_v4 }
 0xb5d   :  { %9297 = vmatpush3.bf16.msra.mxu1 %v9966_v12 }
 0xb5e   :  { %9298 = vmatprep.subr.bf16.mxu1 %v9557_v4 }
 0xb61   :  { %9300 = vmatpush3.bf16.msra.mxu1 %v10067_v33 }
 0xb62   :  { %9301 = vmatprep.subr.bf16.mxu1 %v9557_v4 }
 0xb65   :  { %9303 = vmatpush3.bf16.msra.mxu1 %v10073_v24 }
 0xb66   :  { %9304 = vmatprep.subr.bf16.mxu1 %v9557_v4 }
 0xb69   :  { %9306 = vmatpush3.bf16.msra.mxu1 %v10079_v8 }
 0xb6a   :  { %9307 = vmatprep.subr.bf16.mxu1 %v9557_v4 }
 0xb6d   :  { %9309 = vmatpush3.bf16.msra.mxu1 %v10085_v44 }
 0xb6e   :  { %9310 = vmatprep.subr.bf16.mxu1 %v9557_v4 }
 0xb71   :  { %9312 = vmatpush3.bf16.msra.mxu1 %v10091_v29 }
 0xb72   :  { %9313 = vmatprep.subr.bf16.mxu1 %v9557_v4 }
 0xb75   :  { %9315 = vmatpush3.bf16.msra.mxu1 %v10100_v28 }
 0xb76   :  { %9316 = vmatprep.subr.bf16.mxu1 %v9557_v4 }
 0xb78   :  { %8092 = vmatmul.mubr.f32.vlgmr.msra.gmra.mrb[6].mxu1 %v4991_v17 }
 0xb79   :  { %9318 = vmatpush3.bf16.msra.mxu1 %v10351_v3  ;;  %8126 = vmatprep.mubr.msk.f32.mxu1 %vm9558_vm0, %v9559_v14 }
 0xb7a   :  { %9319 = vmatprep.subr.bf16.mxu1 %v9557_v4 }
 0xb7d   :  { %9321 = vmatpush3.bf16.msra.mxu1 %v10361_v7 }
 0xb7e   :  { %9322 = vmatprep.subr.bf16.mxu1 %v9557_v4 }
 0xb81   :  { %9324 = vmatpush3.bf16.msra.mxu1 %v10371_v43 }
 0xb82   :  { %9325 = vmatprep.subr.bf16.mxu1 %v9557_v4 }
 0xb85   :  { %9327 = vmatpush3.bf16.msra.mxu1 %v10379_v0 }
 0xb86   :  { %9328 = vmatprep.subr.bf16.mxu1 %v9557_v4 }
 0xb89   :  { %9330 = vmatpush3.bf16.msra.mxu1 %v10387_v48 }
 0xb8a   :  { %9331 = vmatprep.subr.bf16.mxu1 %v9557_v4 }
 0xb8d   :  { %9333 = vmatpush3.bf16.msra.mxu1 %v10395_v31 }
 0xb8e   :  { %9334 = vmatprep.subr.bf16.mxu1 %v9557_v4 }
 0xb91   :  { %9336 = vmatpush3.bf16.msra.mxu1 %v10403_v16 }
 0xb92   :  { %9337 = vmatprep.subr.bf16.mxu1 %v9557_v4 }
 0xb95   :  { %9339 = vmatpush3.bf16.msra.mxu1 %v10411_v34 }
 0xb96   :  { %9340 = vmatprep.subr.bf16.mxu1 %v9557_v4 }
 0xb98   :  { %8127 = vmatmul.mubr.f32.vlgmr.msra.gmra.mrb[6].mxu1 %v11029_v23 }
 0xb99   :  { %9342 = vmatpush3.bf16.msra.mxu1 %v9959_v63  ;;  %8161 = vmatprep.mubr.msk.f32.mxu1 %vm9558_vm0, %v9559_v14 }
 0xb9a   :  { %9343 = vmatprep.subr.bf16.mxu1 %v9557_v4 }
 0xb9d   :  { %9345 = vmatpush3.bf16.msra.mxu1 %v9966_v12 }
 0xb9e   :  { %9346 = vmatprep.subr.bf16.mxu1 %v9557_v4 }
 0xba1   :  { %9348 = vmatpush3.bf16.msra.mxu1 %v10067_v33 }
 0xba2   :  { %9349 = vmatprep.subr.bf16.mxu1 %v9557_v4 }
 0xba5   :  { %9351 = vmatpush3.bf16.msra.mxu1 %v10073_v24 }
 0xba6   :  { %9352 = vmatprep.subr.bf16.mxu1 %v9557_v4 }
 0xba9   :  { %9354 = vmatpush3.bf16.msra.mxu1 %v10079_v8 }
 0xbaa   :  { %9355 = vmatprep.subr.bf16.mxu1 %v9557_v4 }
 0xbad   :  { %9357 = vmatpush3.bf16.msra.mxu1 %v10085_v44 }
 0xbae   :  { %9358 = vmatprep.subr.bf16.mxu1 %v9557_v4 }
 0xbb1   :  { %9360 = vmatpush3.bf16.msra.mxu1 %v10091_v29 }
 0xbb2   :  { %9361 = vmatprep.subr.bf16.mxu1 %v9557_v4 }
 0xbb5   :  { %9363 = vmatpush3.bf16.msra.mxu1 %v10100_v28 }
 0xbb8   :  { %8162 = vmatmul.mubr.f32.vlgmr.msra.gmra.mrb[6].mxu1 %v11029_v23 }
 0xc8b   :  { %v5545_v63 = vpop.f32.mrb[6].mxu1 }
 0xc8c   :  { %v5549_v12 = vadd.f32 %v10250_v9, %v5545_v63  ;;  %v8163_v33 = vpop.f32.mrb[7].mxu1 }
 0xc8e   :  { %9503 = vtanh.f32 %v5549_v12 }
 0xc98   :  { %v9504_v24 = vpop.eup %9503 }
 0xc99   :  { %5571 = vst [vmem:[%s11135_s4 + $0x38] sm:$0xff] %v9504_v24  ;;  %5553 = vst [vmem:[%s11136_s5] sm:$0xff] %v9504_v24 }
 0xc9a   :  { %5562 = vsyncpa [#allocation3], 1 }
 0xc9b   :  { %5563 = vsyncpa [#allocation5], 1 }

</bundles_post_ra>
